<compile_context>
chip_gen: v5e
topology: v5e:2x2
jax: 0.10.0
libtpu: 0.0.40
codegen_flags: <defaults>
</compile_context>

<pallas_src>
import functools

import jax
import jax.numpy as jnp
from jax.experimental import pallas as pl
from jax.experimental.pallas import tpu as pltpu

HEIGHT = 28
WIDTH = 28
IN_DIM = HEIGHT * WIDTH  # 784
LANE = 128


def _rup(n, m):
    return (n + m - 1) // m * m


IN_PAD = _rup(IN_DIM, LANE)  # 896 = 7 * 128


# ----------------------------------------------------------------------------
# Kernel: one batch tile of the whole VAE forward pass.
# ----------------------------------------------------------------------------
def _vae_kernel(x_ref, mask_ref, eps_ref,
                w1_ref, w2_ref, wmulv_ref, w3_ref, w4_ref, wo_ref,
                b_ref,
                mulv_ref, xprime_ref,
                *, ed_pad, boffs):
    f32 = jnp.float32
    bf16 = jnp.bfloat16

    def bias(name):
        off, width = boffs[name]
        return b_ref[:, off:off + width]           # static, 128-lane-aligned slice

    x = x_ref[...]                                 # (TB, IN_PAD) bf16

    # ---- encode ----
    h1 = jnp.dot(x, w1_ref[...], preferred_element_type=f32) + bias("b1")
    h1 = jnp.maximum(h1, 0.0) * mask_ref[...]      # relu + inverted dropout (f32)

    h2 = jnp.dot(h1.astype(bf16), w2_ref[...], preferred_element_type=f32) + bias("b2")
    h2 = jnp.maximum(h2, 0.0)

    # fused fc_mu | fc_logvar: one matmul, one lane-dense (TB, 2*ed_pad) store.
    mulv = jnp.dot(h2.astype(bf16), wmulv_ref[...],
                   preferred_element_type=f32) + bias("bmulv")
    mulv_ref[...] = mulv

    mu = mulv[:, :ed_pad]                          # 128-lane tile-aligned slices
    logvar = mulv[:, ed_pad:]

    # ---- reparameterize: z = mu + eps * exp(logvar / 2)  (f32) ----
    # padded lanes: mu=0, logvar=0 -> exp(0)=1, eps_pad=0 -> z pad lanes stay 0.
    z = mu + eps_ref[...] * jnp.exp(logvar * 0.5)

    # ---- decode ----
    d1 = jnp.dot(z.astype(bf16), w3_ref[...], preferred_element_type=f32) + bias("b3")
    d1 = jnp.maximum(d1, 0.0)
    d2 = jnp.dot(d1.astype(bf16), w4_ref[...], preferred_element_type=f32) + bias("b4")
    d2 = jnp.maximum(d2, 0.0)
    out = jnp.dot(d2.astype(bf16), wo_ref[...], preferred_element_type=f32) + bias("bo")
    xprime_ref[...] = jax.nn.sigmoid(out)          # (TB, IN_PAD), lane-dense f32
    # TODO(synk): emit x_prime as bf16 if downstream tolerates it (halves the
    # largest output DMA).


# ----------------------------------------------------------------------------
# One-time parameter packing (hoisted out of the per-call jitted path).
# ----------------------------------------------------------------------------
def prepare_params(params, *, encoded_dim, hidden_dims):
    """Pack / cast / pad weights once.  Returns (packed_arrays, static_meta)."""
    h0, h1 = hidden_dims
    ed = encoded_dim
    ed_pad = _rup(ed, LANE)
    f32, bf16 = jnp.float32, jnp.bfloat16

    # TODO(synk): generalize to hidden dims that are not multiples of 128.
    assert h0 % LANE == 0 and h1 % LANE == 0, "hidden_dims must be multiples of 128"

    (w1, b1, w2, b2, wmu, bmu, wlv, blv, w3, b3, w4, b4, wo, bo) = params

    # Weights pre-transposed (in, out), bf16, lane-padded where needed.
    w1p = jnp.zeros((IN_PAD, h0), bf16).at[:IN_DIM].set(w1.astype(bf16))
    w2b = w2.astype(bf16)
    # mu on out-lanes [0, ed), logvar on out-lanes [ed_pad, ed_pad+ed); rest zero.
    wmulv = jnp.zeros((h1, 2 * ed_pad), bf16)
    wmulv = wmulv.at[:, :ed].set(wmu.astype(bf16))
    wmulv = wmulv.at[:, ed_pad:ed_pad + ed].set(wlv.astype(bf16))
    w3p = jnp.zeros((ed_pad, h1), bf16).at[:ed].set(w3.astype(bf16))
    w4b = w4.astype(bf16)
    wop = jnp.zeros((h0, IN_PAD), bf16).at[:, :IN_DIM].set(wo.astype(bf16))

    # Pack all biases into one lane-aligned f32 row (1 DMA instead of 7).
    segs = [("b1", h0), ("b2", h1), ("bmulv", 2 * ed_pad),
            ("b3", h1), ("b4", h0), ("bo", IN_PAD)]
    boffs, off = {}, 0
    for name, width in segs:
        boffs[name] = (off, width)
        off = _rup(off + width, LANE)
    b_total = off

    bmulv = jnp.zeros((1, 2 * ed_pad), f32)
    bmulv = bmulv.at[:, :ed].set(bmu)
    bmulv = bmulv.at[:, ed_pad:ed_pad + ed].set(blv)
    bop = jnp.zeros((1, IN_PAD), f32).at[:, :IN_DIM].set(bo)
    b_packed = jnp.zeros((1, b_total), f32)
    for name, arr in (("b1", b1), ("b2", b2), ("bmulv", bmulv),
                      ("b3", b3), ("b4", b4), ("bo", bop)):
        o, w = boffs[name]
        b_packed = b_packed.at[:, o:o + w].set(arr)

    packed = (w1p, w2b, wmulv, w3p, w4b, wop, b_packed)
    boffs_t = tuple((name, o, w) for name, (o, w) in boffs.items())
    meta = (ed, ed_pad, boffs_t)
    return jax.device_put(packed), meta


# ----------------------------------------------------------------------------
# Per-call forward (only input padding + the pallas_call live here).
# ----------------------------------------------------------------------------
@functools.partial(jax.jit, static_argnames=("ed", "ed_pad", "boffs_t"))
def _vae_forward_impl(x_nchw, drop_mask, eps, packed, *, ed, ed_pad, boffs_t):
    f32, bf16 = jnp.float32, jnp.bfloat16
    w1p, w2b, wmulv, w3p, w4b, wop, b_packed = packed
    boffs = {name: (o, w) for name, o, w in boffs_t}

    B = x_nchw.shape[0]
    h0 = drop_mask.shape[1]

    # Batch tile: multiple of 256 for full MXU rows (v6e/v7x) when batch is big,
    # otherwise one small 16-row tile (bf16 packs 16 sublanes per vreg).
    TB = 256 if B >= 256 else max(16, _rup(B, 16))
    Bp = _rup(B, TB)
    n_tiles = Bp // TB

    # --- inputs: flatten NCHW like torch.reshape, pad, cast x to bf16 ---
    x_flat = x_nchw.reshape(B, IN_DIM)
    x_pad = jnp.zeros((Bp, IN_PAD), bf16).at[:B, :IN_DIM].set(x_flat.astype(bf16))
    mask_pad = jnp.zeros((Bp, h0), f32).at[:B].set(drop_mask)
    eps_pad = jnp.zeros((Bp, ed_pad), f32).at[:B, :ed].set(eps)

    in_arrays = (x_pad, mask_pad, eps_pad,
                 w1p, w2b, wmulv, w3p, w4b, wop, b_packed)

    batch_spec = lambda shape: pl.BlockSpec(shape, lambda i: (i, 0))
    const_spec = lambda shape: pl.BlockSpec(shape, lambda i: (0, 0))
    in_specs = [
        batch_spec((TB, IN_PAD)),
        batch_spec((TB, h0)),
        batch_spec((TB, ed_pad)),
        const_spec(w1p.shape),
        const_spec(w2b.shape),
        const_spec(wmulv.shape),
        const_spec(w3p.shape),
        const_spec(w4b.shape),
        const_spec(wop.shape),
        const_spec(b_packed.shape),
    ]
    out_shapes = (
        jax.ShapeDtypeStruct((Bp, 2 * ed_pad), f32),   # mu | logvar (lane-dense)
        jax.ShapeDtypeStruct((Bp, IN_PAD), f32),       # x_prime (flat, lane-padded)
    )
    out_specs = (
        batch_spec((TB, 2 * ed_pad)),
        batch_spec((TB, IN_PAD)),
    )

    kernel = functools.partial(_vae_kernel, ed_pad=ed_pad, boffs=boffs)

    # TODO(synk): for repeated tiny-batch inference, keep weights resident across
    # calls via a cross-pallas_call prefetch (semaphore/VMEM-space outputs)
    # instead of re-DMAing ~1 MB of weights every call.
    mulv, xprime_flat = pl.pallas_call(
        kernel,
        out_shape=out_shapes,
        grid=(n_tiles,),
        in_specs=in_specs,
        out_specs=out_specs,
        compiler_params=pltpu.CompilerParams(
            dimension_semantics=("parallel",),   # split batch tiles across TCs
            vmem_limit_bytes=32 << 20,           # sized for v7x scoped budget
        ),
    )(*in_arrays)

    mu = mulv[:B, :ed]
    logvar = mulv[:B, ed_pad:ed_pad + ed]
    x_prime = xprime_flat[:B, :IN_DIM].reshape(B, 1, HEIGHT, WIDTH)
    return mu, logvar, x_prime


def vae_forward(x_nchw, packed, meta, drop_mask, eps):
    ed, ed_pad, boffs_t = meta
    return _vae_forward_impl(x_nchw, drop_mask, eps, packed,
                             ed=ed, ed_pad=ed_pad, boffs_t=boffs_t)


# ----------------------------------------------------------------------------
# Init + pure-JAX reference (for the sanity check)
# ----------------------------------------------------------------------------
def init_params(key, encoded_dim, hidden_dims):
    """Deterministic init mimicking nn.Linear's U(-1/sqrt(fan_in), 1/sqrt(fan_in)).
    Weights stored pre-transposed as (in_features, out_features), f32."""
    h0, h1 = hidden_dims
    dims = [
        (IN_DIM, h0),        # fc1
        (h0, h1),            # fc2
        (h1, encoded_dim),   # fc_mu
        (h1, encoded_dim),   # fc_logvar
        (encoded_dim, h1),   # fc_3
        (h1, h0),            # fc_4
        (h0, IN_DIM),        # fc_output
    ]
    params = []
    for (fan_in, fan_out) in dims:
        key, kw, kb = jax.random.split(key, 3)
        bound = 1.0 / jnp.sqrt(fan_in)
        w = jax.random.uniform(kw, (fan_in, fan_out), jnp.float32, -bound, bound)
        b = jax.random.uniform(kb, (1, fan_out), jnp.float32, -bound, bound)
        params.extend([w, b])
    return tuple(params)


def _reference_forward(x_nchw, params, drop_mask, eps):
    """Pure-JAX f32 reference of the same forward pass."""
    (w1, b1, w2, b2, wmu, bmu, wlv, blv, w3, b3, w4, b4, wo, bo) = params
    B = x_nchw.shape[0]
    x = x_nchw.reshape(B, IN_DIM)
    h1 = jnp.maximum(x @ w1 + b1, 0.0) * drop_mask
    h2 = jnp.maximum(h1 @ w2 + b2, 0.0)
    mu = h2 @ wmu + bmu
    logvar = h2 @ wlv + blv
    z = mu + eps * jnp.exp(logvar * 0.5)
    d1 = jnp.maximum(z @ w3 + b3, 0.0)
    d2 = jnp.maximum(d1 @ w4 + b4, 0.0)
    xp = jax.nn.sigmoid(d2 @ wo + bo).reshape(B, 1, HEIGHT, WIDTH)
    return mu, logvar, xp


if __name__ == "__main__":
    encoded_dim = 32
    hidden_dims = (256, 128)
    dropout_p = 0.1
    B = 8

    root = jax.random.PRNGKey(0)
    k_x, k_p, k_drop, k_eps = jax.random.split(root, 4)

    # NCHW input, like the PyTorch module expects.
    x = jax.random.uniform(k_x, (B, 1, HEIGHT, WIDTH), jnp.float32)

    params = init_params(k_p, encoded_dim, hidden_dims)

    # One-time weight packing / casting (hoisted out of the per-call path).
    packed, meta = prepare_params(params, encoded_dim=encoded_dim,
                                  hidden_dims=hidden_dims)

    # dropout mask with inverted-dropout scaling (F.dropout defaults training=True)
    keep = jax.random.bernoulli(k_drop, 1.0 - dropout_p, (B, hidden_dims[0]))
    drop_mask = keep.astype(jnp.float32) / (1.0 - dropout_p)

    # eps ~ N(0, 1) for the reparameterization trick
    eps = jax.random.normal(k_eps, (B, encoded_dim), jnp.float32)

    mu, logvar, x_prime = vae_forward(x, packed, meta, drop_mask, eps)
    jax.block_until_ready((mu, logvar, x_prime))

    assert mu.shape == (B, encoded_dim)
    assert logvar.shape == (B, encoded_dim)
    assert x_prime.shape == (B, 1, HEIGHT, WIDTH)
    assert bool(jnp.all(jnp.isfinite(x_prime)))
    assert bool(jnp.all((x_prime >= 0.0) & (x_prime <= 1.0)))

    # Loose numerical check vs f32 reference (bf16 weights => ~1e-2 drift budget).
    mu_r, lv_r, xp_r = _reference_forward(x, params, drop_mask, eps)
    assert bool(jnp.max(jnp.abs(mu - mu_r)) < 0.05)
    assert bool(jnp.max(jnp.abs(logvar - lv_r)) < 0.05)
    assert bool(jnp.max(jnp.abs(x_prime - xp_r)) < 0.05)

    print("KERNEL_OK")
</pallas_src>

<mosaic_0001>
module attributes {stable_mosaic.version = 11 : i64} {
  func.func @_vae_kernel(%arg0: i32, %arg1: memref<16x896xbf16, #tpu.memory_space<vmem>>, %arg2: memref<16x256xf32, #tpu.memory_space<vmem>>, %arg3: memref<16x128xf32, #tpu.memory_space<vmem>>, %arg4: memref<896x256xbf16, #tpu.memory_space<vmem>>, %arg5: memref<256x128xbf16, #tpu.memory_space<vmem>>, %arg6: memref<128x256xbf16, #tpu.memory_space<vmem>>, %arg7: memref<128x128xbf16, #tpu.memory_space<vmem>>, %arg8: memref<128x256xbf16, #tpu.memory_space<vmem>>, %arg9: memref<256x896xbf16, #tpu.memory_space<vmem>>, %arg10: memref<1x1920xf32, #tpu.memory_space<vmem>>, %arg11: memref<16x256xf32, #tpu.memory_space<vmem>>, %arg12: memref<16x896xf32, #tpu.memory_space<vmem>>) attributes {dimension_semantics = [#tpu.dimension_semantics<parallel>], iteration_bounds = array<i64: 1>, scalar_prefetch = 0 : i64, scratch_operands = 0 : i64, tpu.core_type = #tpu.core_type<tc>, window_params = [{transform_indices = @transform_0, window_bounds = array<i64: 16, 896>}, {transform_indices = @transform_1, window_bounds = array<i64: 16, 256>}, {transform_indices = @transform_2, window_bounds = array<i64: 16, 128>}, {pipeline_mode = #tpu.pipeline_mode<synchronous>, transform_indices = @transform_3, window_bounds = array<i64: 896, 256>}, {pipeline_mode = #tpu.pipeline_mode<synchronous>, transform_indices = @transform_4, window_bounds = array<i64: 256, 128>}, {pipeline_mode = #tpu.pipeline_mode<synchronous>, transform_indices = @transform_5, window_bounds = array<i64: 128, 256>}, {pipeline_mode = #tpu.pipeline_mode<synchronous>, transform_indices = @transform_6, window_bounds = array<i64: 128, 128>}, {pipeline_mode = #tpu.pipeline_mode<synchronous>, transform_indices = @transform_7, window_bounds = array<i64: 128, 256>}, {pipeline_mode = #tpu.pipeline_mode<synchronous>, transform_indices = @transform_8, window_bounds = array<i64: 256, 896>}, {pipeline_mode = #tpu.pipeline_mode<synchronous>, transform_indices = @transform_9, window_bounds = array<i64: 1, 1920>}, {transform_indices = @transform_10, window_bounds = array<i64: 16, 256>}, {transform_indices = @transform_11, window_bounds = array<i64: 16, 896>}]} {
    %c0 = arith.constant 0 : index
    %c0_0 = arith.constant 0 : index
    %0 = vector.load %arg1[%c0, %c0_0] : memref<16x896xbf16, #tpu.memory_space<vmem>>, vector<16x896xbf16>
    %c0_1 = arith.constant 0 : index
    %c0_2 = arith.constant 0 : index
    %1 = vector.load %arg4[%c0_1, %c0_2] : memref<896x256xbf16, #tpu.memory_space<vmem>>, vector<896x256xbf16>
    %cst = arith.constant dense<0.000000e+00> : vector<16x256xf32>
    %2 = tpu.matmul %0, %1, %cst {dimension_numbers = #tpu.dot_dimension_numbers<[1], [0], [0], [1], [0, 0, 1, 1], [], []>} : vector<16x896xbf16>, vector<896x256xbf16>, vector<16x256xf32> -> vector<16x256xf32>
    %c0_3 = arith.constant 0 : index
    %c0_4 = arith.constant 0 : index
    %3 = vector.load %arg10[%c0_3, %c0_4] : memref<1x1920xf32, #tpu.memory_space<vmem>>, vector<1x256xf32>
    %4 = vector.broadcast %3 : vector<1x256xf32> to vector<16x256xf32>
    %5 = arith.addf %2, %4 : vector<16x256xf32>
    %cst_5 = arith.constant 0.000000e+00 : f32
    %6 = vector.broadcast %cst_5 : f32 to vector<16x256xf32>
    %7 = arith.maximumf %5, %6 : vector<16x256xf32>
    %c0_6 = arith.constant 0 : index
    %c0_7 = arith.constant 0 : index
    %8 = vector.load %arg2[%c0_6, %c0_7] : memref<16x256xf32, #tpu.memory_space<vmem>>, vector<16x256xf32>
    %9 = arith.mulf %7, %8 : vector<16x256xf32>
    %10 = arith.truncf %9 : vector<16x256xf32> to vector<16x256xbf16>
    %c0_8 = arith.constant 0 : index
    %c0_9 = arith.constant 0 : index
    %11 = vector.load %arg5[%c0_8, %c0_9] : memref<256x128xbf16, #tpu.memory_space<vmem>>, vector<256x128xbf16>
    %cst_10 = arith.constant dense<0.000000e+00> : vector<16x128xf32>
    %12 = tpu.matmul %10, %11, %cst_10 {dimension_numbers = #tpu.dot_dimension_numbers<[1], [0], [0], [1], [0, 0, 1, 1], [], []>} : vector<16x256xbf16>, vector<256x128xbf16>, vector<16x128xf32> -> vector<16x128xf32>
    %c0_11 = arith.constant 0 : index
    %c256 = arith.constant 256 : index
    %13 = vector.load %arg10[%c0_11, %c256] : memref<1x1920xf32, #tpu.memory_space<vmem>>, vector<1x128xf32>
    %14 = vector.broadcast %13 : vector<1x128xf32> to vector<16x128xf32>
    %15 = arith.addf %12, %14 : vector<16x128xf32>
    %cst_12 = arith.constant 0.000000e+00 : f32
    %16 = vector.broadcast %cst_12 : f32 to vector<16x128xf32>
    %17 = arith.maximumf %15, %16 : vector<16x128xf32>
    %18 = arith.truncf %17 : vector<16x128xf32> to vector<16x128xbf16>
    %c0_13 = arith.constant 0 : index
    %c0_14 = arith.constant 0 : index
    %19 = vector.load %arg6[%c0_13, %c0_14] : memref<128x256xbf16, #tpu.memory_space<vmem>>, vector<128x256xbf16>
    %cst_15 = arith.constant dense<0.000000e+00> : vector<16x256xf32>
    %20 = tpu.matmul %18, %19, %cst_15 {dimension_numbers = #tpu.dot_dimension_numbers<[1], [0], [0], [1], [0, 0, 1, 1], [], []>} : vector<16x128xbf16>, vector<128x256xbf16>, vector<16x256xf32> -> vector<16x256xf32>
    %c0_16 = arith.constant 0 : index
    %c384 = arith.constant 384 : index
    %21 = vector.load %arg10[%c0_16, %c384] : memref<1x1920xf32, #tpu.memory_space<vmem>>, vector<1x256xf32>
    %22 = vector.broadcast %21 : vector<1x256xf32> to vector<16x256xf32>
    %23 = arith.addf %20, %22 : vector<16x256xf32>
    %c0_17 = arith.constant 0 : index
    %c0_18 = arith.constant 0 : index
    %24 = vector.load %arg11[%c0_17, %c0_18] : memref<16x256xf32, #tpu.memory_space<vmem>>, vector<16x256xf32>
    tpu.vector_store %arg11[%c0_17, %c0_18], %23 {strides = array<i32>} : memref<16x256xf32, #tpu.memory_space<vmem>>, vector<16x256xf32>,
    %25 = vector.extract_strided_slice %23 {offsets = [0, 0], sizes = [16, 128], strides = [1, 1]} : vector<16x256xf32> to vector<16x128xf32>
    %26 = vector.extract_strided_slice %23 {offsets = [0, 128], sizes = [16, 128], strides = [1, 1]} : vector<16x256xf32> to vector<16x128xf32>
    %c0_19 = arith.constant 0 : index
    %c0_20 = arith.constant 0 : index
    %27 = vector.load %arg3[%c0_19, %c0_20] : memref<16x128xf32, #tpu.memory_space<vmem>>, vector<16x128xf32>
    %cst_21 = arith.constant 5.000000e-01 : f32
    %28 = vector.broadcast %cst_21 : f32 to vector<16x128xf32>
    %29 = arith.mulf %26, %28 : vector<16x128xf32>
    %30 = math.exp %29 : vector<16x128xf32>
    %31 = arith.mulf %27, %30 : vector<16x128xf32>
    %32 = arith.addf %25, %31 : vector<16x128xf32>
    %33 = arith.truncf %32 : vector<16x128xf32> to vector<16x128xbf16>
    %c0_22 = arith.constant 0 : index
    %c0_23 = arith.constant 0 : index
    %34 = vector.load %arg7[%c0_22, %c0_23] : memref<128x128xbf16, #tpu.memory_space<vmem>>, vector<128x128xbf16>
    %cst_24 = arith.constant dense<0.000000e+00> : vector<16x128xf32>
    %35 = tpu.matmul %33, %34, %cst_24 {dimension_numbers = #tpu.dot_dimension_numbers<[1], [0], [0], [1], [0, 0, 1, 1], [], []>} : vector<16x128xbf16>, vector<128x128xbf16>, vector<16x128xf32> -> vector<16x128xf32>
    %c0_25 = arith.constant 0 : index
    %c640 = arith.constant 640 : index
    %36 = vector.load %arg10[%c0_25, %c640] : memref<1x1920xf32, #tpu.memory_space<vmem>>, vector<1x128xf32>
    %37 = vector.broadcast %36 : vector<1x128xf32> to vector<16x128xf32>
    %38 = arith.addf %35, %37 : vector<16x128xf32>
    %cst_26 = arith.constant 0.000000e+00 : f32
    %39 = vector.broadcast %cst_26 : f32 to vector<16x128xf32>
    %40 = arith.maximumf %38, %39 : vector<16x128xf32>
    %41 = arith.truncf %40 : vector<16x128xf32> to vector<16x128xbf16>
    %c0_27 = arith.constant 0 : index
    %c0_28 = arith.constant 0 : index
    %42 = vector.load %arg8[%c0_27, %c0_28] : memref<128x256xbf16, #tpu.memory_space<vmem>>, vector<128x256xbf16>
    %cst_29 = arith.constant dense<0.000000e+00> : vector<16x256xf32>
    %43 = tpu.matmul %41, %42, %cst_29 {dimension_numbers = #tpu.dot_dimension_numbers<[1], [0], [0], [1], [0, 0, 1, 1], [], []>} : vector<16x128xbf16>, vector<128x256xbf16>, vector<16x256xf32> -> vector<16x256xf32>
    %c0_30 = arith.constant 0 : index
    %c768 = arith.constant 768 : index
    %44 = vector.load %arg10[%c0_30, %c768] : memref<1x1920xf32, #tpu.memory_space<vmem>>, vector<1x256xf32>
    %45 = vector.broadcast %44 : vector<1x256xf32> to vector<16x256xf32>
    %46 = arith.addf %43, %45 : vector<16x256xf32>
    %cst_31 = arith.constant 0.000000e+00 : f32
    %47 = vector.broadcast %cst_31 : f32 to vector<16x256xf32>
    %48 = arith.maximumf %46, %47 : vector<16x256xf32>
    %49 = arith.truncf %48 : vector<16x256xf32> to vector<16x256xbf16>
    %c0_32 = arith.constant 0 : index
    %c0_33 = arith.constant 0 : index
    %50 = vector.load %arg9[%c0_32, %c0_33] : memref<256x896xbf16, #tpu.memory_space<vmem>>, vector<256x896xbf16>
    %cst_34 = arith.constant dense<0.000000e+00> : vector<16x896xf32>
    %51 = tpu.matmul %49, %50, %cst_34 {dimension_numbers = #tpu.dot_dimension_numbers<[1], [0], [0], [1], [0, 0, 1, 1], [], []>} : vector<16x256xbf16>, vector<256x896xbf16>, vector<16x896xf32> -> vector<16x896xf32>
    %c0_35 = arith.constant 0 : index
    %c1024 = arith.constant 1024 : index
    %52 = vector.load %arg10[%c0_35, %c1024] : memref<1x1920xf32, #tpu.memory_space<vmem>>, vector<1x896xf32>
    %53 = vector.broadcast %52 : vector<1x896xf32> to vector<16x896xf32>
    %54 = arith.addf %51, %53 : vector<16x896xf32>
    %55 = arith.negf %54 : vector<16x896xf32>
    %56 = math.exp %55 : vector<16x896xf32>
    %cst_36 = arith.constant 1.000000e+00 : f32
    %57 = vector.broadcast %cst_36 : f32 to vector<16x896xf32>
    %58 = arith.addf %57, %56 : vector<16x896xf32>
    %59 = arith.divf %57, %58 : vector<16x896xf32>
    %c0_37 = arith.constant 0 : index
    %c0_38 = arith.constant 0 : index
    %60 = vector.load %arg12[%c0_37, %c0_38] : memref<16x896xf32, #tpu.memory_space<vmem>>, vector<16x896xf32>
    tpu.vector_store %arg12[%c0_37, %c0_38], %59 {strides = array<i32>} : memref<16x896xf32, #tpu.memory_space<vmem>>, vector<16x896xf32>,
    return
  }
  func.func @transform_0(%arg0: i32) -> (i32, i32) {
    %c0_i32 = arith.constant 0 : i32
    %c0_i32_0 = arith.constant 0 : i32
    return %arg0, %c0_i32 : i32, i32
  }
  func.func @transform_1(%arg0: i32) -> (i32, i32) {
    %c0_i32 = arith.constant 0 : i32
    %c0_i32_0 = arith.constant 0 : i32
    return %arg0, %c0_i32 : i32, i32
  }
  func.func @transform_2(%arg0: i32) -> (i32, i32) {
    %c0_i32 = arith.constant 0 : i32
    %c0_i32_0 = arith.constant 0 : i32
    return %arg0, %c0_i32 : i32, i32
  }
  func.func @transform_3(%arg0: i32) -> (i32, i32) {
    %c0_i32 = arith.constant 0 : i32
    %c0_i32_0 = arith.constant 0 : i32
    %c0_i32_1 = arith.constant 0 : i32
    return %c0_i32, %c0_i32_0 : i32, i32
  }
  func.func @transform_4(%arg0: i32) -> (i32, i32) {
    %c0_i32 = arith.constant 0 : i32
    %c0_i32_0 = arith.constant 0 : i32
    %c0_i32_1 = arith.constant 0 : i32
    return %c0_i32, %c0_i32_0 : i32, i32
  }
  func.func @transform_5(%arg0: i32) -> (i32, i32) {
    %c0_i32 = arith.constant 0 : i32
    %c0_i32_0 = arith.constant 0 : i32
    %c0_i32_1 = arith.constant 0 : i32
    return %c0_i32, %c0_i32_0 : i32, i32
  }
  func.func @transform_6(%arg0: i32) -> (i32, i32) {
    %c0_i32 = arith.constant 0 : i32
    %c0_i32_0 = arith.constant 0 : i32
    %c0_i32_1 = arith.constant 0 : i32
    return %c0_i32, %c0_i32_0 : i32, i32
  }
  func.func @transform_7(%arg0: i32) -> (i32, i32) {
    %c0_i32 = arith.constant 0 : i32
    %c0_i32_0 = arith.constant 0 : i32
    %c0_i32_1 = arith.constant 0 : i32
    return %c0_i32, %c0_i32_0 : i32, i32
  }
  func.func @transform_8(%arg0: i32) -> (i32, i32) {
    %c0_i32 = arith.constant 0 : i32
    %c0_i32_0 = arith.constant 0 : i32
    %c0_i32_1 = arith.constant 0 : i32
    return %c0_i32, %c0_i32_0 : i32, i32
  }
  func.func @transform_9(%arg0: i32) -> (i32, i32) {
    %c0_i32 = arith.constant 0 : i32
    %c0_i32_0 = arith.constant 0 : i32
    %c0_i32_1 = arith.constant 0 : i32
    return %c0_i32, %c0_i32_0 : i32, i32
  }
  func.func @transform_10(%arg0: i32) -> (i32, i32) {
    %c0_i32 = arith.constant 0 : i32
    %c0_i32_0 = arith.constant 0 : i32
    return %arg0, %c0_i32 : i32, i32
  }
  func.func @transform_11(%arg0: i32) -> (i32, i32) {
    %c0_i32 = arith.constant 0 : i32
    %c0_i32_0 = arith.constant 0 : i32
    return %arg0, %c0_i32 : i32, i32
  }
}

</mosaic_0001>

<bundles_post_ra>
// kernel: _vae_forward_impl.1
= control target key start
LH: loop header
LB: loop body
LE: loop exit
PB: predicated region body
PF: predicated region fallthrough
CT: control target
= control target key end

     0   :  { %17 = vsyncpa [#allocation3], 0  ;;  %s4938_s0 = inlined_call_operand.vmem [shape: bf16[16,896], index: 0, kind: input, shape index: {}]   ;;  %s4939_s1 = inlined_call_operand.vmem [shape: f32[16,256], index: 1, kind: input, shape index: {}]   ;;  %s4940_s2 = inlined_call_operand.vmem [shape: f32[16,128], index: 2, kind: input, shape index: {}]   ;;  %s4941_s3 = inlined_call_operand.hbm [shape: bf16[896,256], index: 3, kind: input, shape index: {}]   ;;  %s4942_s4 = inlined_call_operand.vmem [shape: bf16[256,128], index: 4, kind: input, shape index: {}]   ;;  %s4943_s5 = inlined_call_operand.vmem [shape: bf16[128,256], index: 5, kind: input, shape index: {}]   ;;  %s4944_s6 = inlined_call_operand.vmem [shape: bf16[128,128], index: 6, kind: input, shape index: {}]   ;;  %s4945_s7 = inlined_call_operand.vmem [shape: bf16[128,256], index: 7, kind: input, shape index: {}]   ;;  %s4946_s8 = inlined_call_operand.hbm [shape: bf16[256,896], index: 8, kind: input, shape index: {}]   ;;  %s4947_s9 = inlined_call_operand.vmem [shape: f32[1,1920], index: 9, kind: input, shape index: {}]   ;;  %s4948_s10 = inlined_call_operand.vmem [shape: f32[16,256], index: 10, kind: output, shape index: {0}]   ;;  %s4949_s11 = inlined_call_operand.vmem [shape: f32[16,896], index: 11, kind: output, shape index: {1}]  }
   0x1   :  { %s29_s19 = sshll.u32 %s4941_s3, 4  ;;  %s30_s19 = int_to_ptr.hbm [resolvable:$true] %s29_s19 }
   0x2   :  { %18 = vsyncpa [#allocation5], 0  ;;  %s4307_s20 = smov [#allocation2]   ;;  %s50_s24 = sshll.u32 %s4946_s8, 4  ;;  %s51_s24 = int_to_ptr.hbm [resolvable:$true] %s50_s24 }
   0x3   :  { %s31_s21 = sshll.u32 %s4307_s20, 4  ;;  %s4308_s25 = smov 128   ;;  %s32_s21 = int_to_ptr.vmem [resolvable:$true] %s31_s21 }
   0x4   :  { %s4309_s26 = smov 8   ;;  %s4310_s27 = smov [#allocation4]  }
   0x5   :  { %37 = dma.hbm_to_vmem [thread:$0]  %s30_s19, 14336, %s32_s21, [#allocation3], %s4308_s25, %s4308_s25, %s4309_s26  }
   0x6   :  { %s52_s28 = sshll.u32 %s4310_s27, 4  ;;  %s4311_s29 = smov 448   ;;  %s53_s28 = int_to_ptr.vmem [resolvable:$true] %s52_s28 }
   0x7   :  { %s4312_s30 = smov 28  }
   0x8   :  { %58 = dma.hbm_to_vmem [thread:$0]  %s51_s24, 14336, %s53_s28, [#allocation5], %s4311_s29, %s4311_s29, %s4312_s30  }
   0x9   :  { %4303 = dma.done.wait [#allocation3], 14336  }
   0xa   :  { %4304 = vsyncadd [#allocation3], 4294952960 }
   0xb   :  { %4305 = dma.done.wait [#allocation5], 14336  }
   0xc   :  { %4306 = vsyncadd [#allocation5], 4294952960  ;;  %v2824_v0 = vld [vmem:[#allocation2 + $0x70] sm:$0xf]  ;;  %v3922_v1 = vld [vmem:[#allocation2 + $0x74] sm:$0xf0] }
   0xd   :  { %v2888_v2 = vld [vmem:[#allocation2 + $0xf0] sm:$0xf]  ;;  %v2825_v3 = vor.u32 %v3922_v1, %v2824_v0  ;;  %v3938_v4 = vld [vmem:[#allocation2 + $0xf4] sm:$0xf0]  ;;  %v2816_v9 = vld [vmem:[#allocation2 + $0x60] sm:$0xf] }
   0xe   :  { %v2952_v5 = vld [vmem:[#allocation2 + $0x170] sm:$0xf]  ;;  %v3954_v6 = vld [vmem:[#allocation2 + $0x174] sm:$0xf0]  ;;  %v2889_v7 = vor.u32 %v3938_v4, %v2888_v2  ;;  %v3920_v10 = vld [vmem:[#allocation2 + $0x64] sm:$0xf0] }
   0xf   :  { %v2953_v8 = vor.u32 %v3954_v6, %v2952_v5  ;;  %v2880_v11 = vld [vmem:[#allocation2 + $0xe0] sm:$0xf]  ;;  %791 = vmatpush.bf16.msra.mxu0 %v2825_v3  ;;  %v2817_v12 = vor.u32 %v3920_v10, %v2816_v9  ;;  %v3936_v13 = vld [vmem:[#allocation2 + $0xe4] sm:$0xf0]  ;;  %v3016_v18 = vld [vmem:[#allocation2 + $0x1f0] sm:$0xf] }
  0x10   :  { %v2944_v14 = vld [vmem:[#allocation2 + $0x160] sm:$0xf]  ;;  %v3952_v15 = vld [vmem:[#allocation2 + $0x164] sm:$0xf0]  ;;  %805 = vmatpush.bf16.msra.mxu1 %v2889_v7  ;;  %v2881_v16 = vor.u32 %v3936_v13, %v2880_v11  ;;  %v3970_v19 = vld [vmem:[#allocation2 + $0x1f4] sm:$0xf0] }
  0x11   :  { %819 = vmatpush.bf16.msra.mxu2 %v2953_v8  ;;  %v2945_v17 = vor.u32 %v3952_v15, %v2944_v14  ;;  %v2808_v20 = vld [vmem:[#allocation2 + $0x50] sm:$0xf]  ;;  %v3017_v21 = vor.u32 %v3970_v19, %v3016_v18  ;;  %v3918_v22 = vld [vmem:[#allocation2 + $0x54] sm:$0xf0]  ;;  %v3008_v27 = vld [vmem:[#allocation2 + $0x1e0] sm:$0xf] }
  0x12   :  { %v2872_v23 = vld [vmem:[#allocation2 + $0xd0] sm:$0xf]  ;;  %v3934_v24 = vld [vmem:[#allocation2 + $0xd4] sm:$0xf0]  ;;  %v2809_v28 = vor.u32 %v3918_v22, %v2808_v20  ;;  %v3968_v29 = vld [vmem:[#allocation2 + $0x1e4] sm:$0xf0] }
  0x13   :  { %v2936_v25 = vld [vmem:[#allocation2 + $0x150] sm:$0xf]  ;;  %v3950_v26 = vld [vmem:[#allocation2 + $0x154] sm:$0xf0]  ;;  %792 = vmatpush.bf16.msra.mxu0 %v2817_v12  ;;  %833 = vmatpush.bf16.msra.mxu3 %v3017_v21  ;;  %v2800_v30 = vld [vmem:[#allocation2 + $0x40] sm:$0xf]  ;;  %v2873_v32 = vor.u32 %v3934_v24, %v2872_v23  ;;  %v3009_v34 = vor.u32 %v3968_v29, %v3008_v27 }
  0x14   :  { %v3916_v31 = vld [vmem:[#allocation2 + $0x44] sm:$0xf0]  ;;  %806 = vmatpush.bf16.msra.mxu1 %v2881_v16  ;;  %v2937_v33 = vor.u32 %v3950_v26, %v2936_v25  ;;  %v2864_v35 = vld [vmem:[#allocation2 + $0xc0] sm:$0xf]  ;;  %v3000_v39 = vld [vmem:[#allocation2 + $0x1d0] sm:$0xf] }
  0x15   :  { %820 = vmatpush.bf16.msra.mxu2 %v2945_v17  ;;  %v3932_v36 = vld [vmem:[#allocation2 + $0xc4] sm:$0xf0]  ;;  %v2928_v37 = vld [vmem:[#allocation2 + $0x140] sm:$0xf]  ;;  %v3966_v40 = vld [vmem:[#allocation2 + $0x1d4] sm:$0xf0]  ;;  %v2801_v41 = vor.u32 %v3916_v31, %v2800_v30 }
  0x16   :  { %v3948_v38 = vld [vmem:[#allocation2 + $0x144] sm:$0xf0]  ;;  %v3001_v42 = vor.u32 %v3966_v40, %v3000_v39  ;;  %v2792_v43 = vld [vmem:[#allocation2 + $0x30] sm:$0xf]  ;;  %v3914_v44 = vld [vmem:[#allocation2 + $0x34] sm:$0xf0]  ;;  %v2865_v45 = vor.u32 %v3932_v36, %v2864_v35 }
  0x17   :  { %793 = vmatpush.bf16.msra.mxu0 %v2809_v28  ;;  %834 = vmatpush.bf16.msra.mxu3 %v3009_v34  ;;  %v2929_v46 = vor.u32 %v3948_v38, %v2928_v37  ;;  %v2856_v47 = vld [vmem:[#allocation2 + $0xb0] sm:$0xf]  ;;  %v2992_v48 = vld [vmem:[#allocation2 + $0x1c0] sm:$0xf]  ;;  %v3964_v49 = vld [vmem:[#allocation2 + $0x1c4] sm:$0xf0]  ;;  %v2793_v53 = vor.u32 %v3914_v44, %v2792_v43 }
  0x18   :  { %807 = vmatpush.bf16.msra.mxu1 %v2873_v32  ;;  %v3930_v50 = vld [vmem:[#allocation2 + $0xb4] sm:$0xf0]  ;;  %v2920_v51 = vld [vmem:[#allocation2 + $0x130] sm:$0xf]  ;;  %v2993_v54 = vor.u32 %v3964_v49, %v2992_v48  ;;  %v2784_v55 = vld [vmem:[#allocation2 + $0x20] sm:$0xf] }
  0x19   :  { %821 = vmatpush.bf16.msra.mxu2 %v2937_v33  ;;  %v3946_v52 = vld [vmem:[#allocation2 + $0x134] sm:$0xf0]  ;;  %v3912_v56 = vld [vmem:[#allocation2 + $0x24] sm:$0xf0]  ;;  %v2857_v57 = vor.u32 %v3930_v50, %v2856_v47  ;;  %v2848_v59 = vld [vmem:[#allocation2 + $0xa0] sm:$0xf] }
  0x1a   :  { %v2921_v58 = vor.u32 %v3946_v52, %v2920_v51  ;;  %v2984_v60 = vld [vmem:[#allocation2 + $0x1b0] sm:$0xf]  ;;  %v3962_v61 = vld [vmem:[#allocation2 + $0x1b4] sm:$0xf0]  ;;  %v3928_v62 = vld [vmem:[#allocation2 + $0xa4] sm:$0xf0]  ;;  %v2785_v1 = vor.u32 %v3912_v56, %v2784_v55 }
  0x1b   :  { %794 = vmatpush.bf16.msra.mxu0 %v2801_v41  ;;  %835 = vmatpush.bf16.msra.mxu3 %v3001_v42  ;;  %v2912_v63 = vld [vmem:[#allocation2 + $0x120] sm:$0xf]  ;;  %v3944_v0 = vld [vmem:[#allocation2 + $0x124] sm:$0xf0]  ;;  %v2985_v2 = vor.u32 %v3962_v61, %v2984_v60  ;;  %v2776_v3 = vld [vmem:[#allocation2 + $0x10] sm:$0xf]  ;;  %v2849_v5 = vor.u32 %v3928_v62, %v2848_v59 }
  0x1c   :  { %808 = vmatpush.bf16.msra.mxu1 %v2865_v45  ;;  %v3910_v4 = vld [vmem:[#allocation2 + $0x14] sm:$0xf0]  ;;  %v2913_v6 = vor.u32 %v3944_v0, %v2912_v63  ;;  %v2840_v7 = vld [vmem:[#allocation2 + $0x90] sm:$0xf]  ;;  %v2976_v8 = vld [vmem:[#allocation2 + $0x1a0] sm:$0xf] }
  0x1d   :  { %822 = vmatpush.bf16.msra.mxu2 %v2929_v46  ;;  %v3960_v9 = vld [vmem:[#allocation2 + $0x1a4] sm:$0xf0]  ;;  %v3926_v10 = vld [vmem:[#allocation2 + $0x94] sm:$0xf0]  ;;  %v2904_v11 = vld [vmem:[#allocation2 + $0x110] sm:$0xf]  ;;  %v2777_v13 = vor.u32 %v3910_v4, %v2776_v3 }
  0x1e   :  { %v3942_v12 = vld [vmem:[#allocation2 + $0x114] sm:$0xf0]  ;;  %v2977_v14 = vor.u32 %v3960_v9, %v2976_v8  ;;  %v2768_v15 = vld [vmem:[#allocation2] sm:$0xf]  ;;  %v3908_v16 = vld [vmem:[#allocation2 + $0x4] sm:$0xf0]  ;;  %v2841_v18 = vor.u32 %v3926_v10, %v2840_v7 }
  0x1f   :  { %795 = vmatpush.bf16.msra.mxu0 %v2793_v53  ;;  %836 = vmatpush.bf16.msra.mxu3 %v2993_v54  ;;  %v2832_v17 = vld [vmem:[#allocation2 + $0x80] sm:$0xf]  ;;  %v2905_v19 = vor.u32 %v3942_v12, %v2904_v11  ;;  %v3924_v20 = vld [vmem:[#allocation2 + $0x84] sm:$0xf0]  ;;  %v2968_v21 = vld [vmem:[#allocation2 + $0x190] sm:$0xf]  ;;  %v2769_v29 = vor.u32 %v3908_v16, %v2768_v15 }
  0x20   :  { %809 = vmatpush.bf16.msra.mxu1 %v2857_v57  ;;  %v3958_v22 = vld [vmem:[#allocation2 + $0x194] sm:$0xf0]  ;;  %v2896_v23 = vld [vmem:[#allocation2 + $0x100] sm:$0xf]  ;;  %v3940_v24 = vld [vmem:[#allocation2 + $0x104] sm:$0xf0]  ;;  %v2833_v33 = vor.u32 %v3924_v20, %v2832_v17 }
  0x21   :  { %823 = vmatpush.bf16.msra.mxu2 %v2921_v58  ;;  %v3080_v25 = vld [vmem:[#allocation2 + $0x270] sm:$0xf]  ;;  %v3986_v26 = vld [vmem:[#allocation2 + $0x274] sm:$0xf0]  ;;  %v2969_v30 = vor.u32 %v3958_v22, %v2968_v21  ;;  %v2897_v34 = vor.u32 %v3940_v24, %v2896_v23  ;;  %v2960_v35 = vld [vmem:[#allocation2 + $0x180] sm:$0xf] }
  0x22   :  { %v3144_v27 = vld [vmem:[#allocation2 + $0x2f0] sm:$0xf]  ;;  %v4002_v28 = vld [vmem:[#allocation2 + $0x2f4] sm:$0xf0]  ;;  %v3956_v36 = vld [vmem:[#allocation2 + $0x184] sm:$0xf0]  ;;  %v3081_v38 = vor.u32 %v3986_v26, %v3080_v25 }
  0x23   :  { %796 = vmatpush.bf16.msra.mxu0 %v2785_v1  ;;  %837 = vmatpush.bf16.msra.mxu3 %v2985_v2  ;;  %v3208_v31 = vld [vmem:[#allocation2 + $0x370] sm:$0xf]  ;;  %v4018_v32 = vld [vmem:[#allocation2 + $0x374] sm:$0xf0]  ;;  %v3072_v37 = vld [vmem:[#allocation2 + $0x260] sm:$0xf]  ;;  %v3145_v39 = vor.u32 %v4002_v28, %v3144_v27  ;;  %v2961_v47 = vor.u32 %v3956_v36, %v2960_v35 }
  0x24   :  { %810 = vmatpush.bf16.msra.mxu1 %v2849_v5  ;;  %v3984_v40 = vld [vmem:[#allocation2 + $0x264] sm:$0xf0]  ;;  %v3921_v41 = vld [vmem:[#allocation2 + $0x74] sm:$0xf]  ;;  %v2826_v42 = vld [vmem:[#allocation2 + $0x78] sm:$0xf0]  ;;  %v3209_v43 = vor.u32 %v4018_v32, %v3208_v31 }
  0x25   :  { %824 = vmatpush.bf16.msra.mxu2 %v2913_v6  ;;  %v3136_v44 = vld [vmem:[#allocation2 + $0x2e0] sm:$0xf]  ;;  %v4000_v45 = vld [vmem:[#allocation2 + $0x2e4] sm:$0xf0]  ;;  %v3903_v50 = vld [vmem:[%s4938_s0 + $0x18] sm:$0xf0]  ;;  %v2829_v51 = vor.u32 %v3921_v41, %v2826_v42  ;;  %v3073_v56 = vor.u32 %v3984_v40, %v3072_v37 }
  0x26   :  { %v3200_v46 = vld [vmem:[#allocation2 + $0x360] sm:$0xf]  ;;  %v4016_v48 = vld [vmem:[#allocation2 + $0x364] sm:$0xf0]  ;;  %v3064_v52 = vld [vmem:[#allocation2 + $0x250] sm:$0xf]  ;;  %v3137_v57 = vor.u32 %v4000_v45, %v3136_v44 }
  0x27   :  { %797 = vmatpush.bf16.msra.mxu0 %v2777_v13  ;;  %838 = vmatpush.bf16.msra.mxu3 %v2977_v14  ;;  %v2740_v49 = vld [vmem:[%s4938_s0] sm:$0xf]  ;;  %v2748_v54 = vld [vmem:[%s4938_s0 + $0x8] sm:$0xf]  ;;  %v3904_v55 = vld [vmem:[%s4938_s0 + $0x20] sm:$0xf0]  ;;  %v3201_v62 = vor.u32 %v4016_v48, %v3200_v46 }
  0x28   :  { %811 = vmatpush.bf16.msra.mxu1 %v2841_v18  ;;  %v4385_v53 = vor.u32 %v3903_v50, %v2740_v49  ;;  %v3982_v58 = vld [vmem:[#allocation2 + $0x254] sm:$0xf0]  ;;  %v3919_v59 = vld [vmem:[#allocation2 + $0x64] sm:$0xf]  ;;  %v2818_v60 = vld [vmem:[#allocation2 + $0x68] sm:$0xf0]  ;;  %v4393_v61 = vor.u32 %v3904_v55, %v2748_v54 }
  0x29   :  { %825 = vmatpush.bf16.msra.mxu2 %v2905_v19  ;;  %v3128_v63 = vld [vmem:[#allocation2 + $0x2d0] sm:$0xf]  ;;  %v3998_v0 = vld [vmem:[#allocation2 + $0x2d4] sm:$0xf0]  ;;  %v3900_v1 = vld [vmem:[%s4938_s0 + $0x4] sm:$0xf]  ;;  %v2821_v5 = vor.u32 %v3919_v59, %v2818_v60  ;;  %v3065_v9 = vor.u32 %v3982_v58, %v3064_v52 }
  0x2a   :  { %v3192_v2 = vld [vmem:[#allocation2 + $0x350] sm:$0xf]  ;;  %v4014_v3 = vld [vmem:[#allocation2 + $0x354] sm:$0xf0]  ;;  %v2742_v4 = vld [vmem:[%s4938_s0 + $0x1c] sm:$0xf0]  ;;  %v3129_v10 = vor.u32 %v3998_v0, %v3128_v63 }
  0x2b   :  { %798 = vmatpush.bf16.msra.mxu0 %v2769_v29  ;;  %839 = vmatpush.bf16.msra.mxu3 %v2969_v30  ;;  %v3056_v6 = vld [vmem:[#allocation2 + $0x240] sm:$0xf]  ;;  %v3980_v7 = vld [vmem:[#allocation2 + $0x244] sm:$0xf0]  ;;  %v4403_v8 = vor.u32 %v3900_v1, %v2742_v4  ;;  %v3917_v12 = vld [vmem:[#allocation2 + $0x54] sm:$0xf]  ;;  %v3193_v14 = vor.u32 %v4014_v3, %v3192_v2 }
  0x2c   :  { %812 = vmatpush.bf16.msra.mxu1 %v2833_v33  ;;  %v3120_v11 = vld [vmem:[#allocation2 + $0x2c0] sm:$0xf]  ;;  %v2810_v13 = vld [vmem:[#allocation2 + $0x58] sm:$0xf0]  ;;  %v3996_v15 = vld [vmem:[#allocation2 + $0x2c4] sm:$0xf0]  ;;  %v3057_v22 = vor.u32 %v3980_v7, %v3056_v6 }
  0x2d   :  { %826 = vmatpush.bf16.msra.mxu2 %v2897_v34  ;;  %v3901_v16 = vld [vmem:[%s4938_s0 + $0xc] sm:$0xf]  ;;  %v2750_v17 = vld [vmem:[%s4938_s0 + $0x24] sm:$0xf0]  ;;  %v3184_v18 = vld [vmem:[#allocation2 + $0x340] sm:$0xf]  ;;  %v2813_v21 = vor.u32 %v3917_v12, %v2810_v13  ;;  %v3121_v23 = vor.u32 %v3996_v15, %v3120_v11 }
  0x2e   :  { %799 = vmatmul.bf16.vlgmr.msra.gmra.mxu0 %v4385_v53  ;;  %v4012_v19 = vld [vmem:[#allocation2 + $0x344] sm:$0xf0]  ;;  %v4412_v20 = vor.u32 %v3901_v16, %v2750_v17  ;;  %v3048_v24 = vld [vmem:[#allocation2 + $0x230] sm:$0xf]  ;;  %v3915_v25 = vld [vmem:[#allocation2 + $0x44] sm:$0xf] }
  0x2f   :  { %847 = vmatpush.bf16.msrb.mxu0 %v3081_v38  ;;  %840 = vmatpush.bf16.msra.mxu3 %v2961_v47  ;;  %v2802_v26 = vld [vmem:[#allocation2 + $0x48] sm:$0xf0]  ;;  %v3185_v27 = vor.u32 %v4012_v19, %v3184_v18  ;;  %v3978_v28 = vld [vmem:[#allocation2 + $0x234] sm:$0xf0]  ;;  %v3112_v29 = vld [vmem:[#allocation2 + $0x2b0] sm:$0xf] }
  0x30   :  { %861 = vmatpush.bf16.msrb.mxu1 %v3145_v39  ;;  %827 = vmatmul.bf16.vlgmr.msra.gmra.mxu2 %v4393_v61  ;;  %v3994_v30 = vld [vmem:[#allocation2 + $0x2b4] sm:$0xf0]  ;;  %v3176_v31 = vld [vmem:[#allocation2 + $0x330] sm:$0xf]  ;;  %v2805_v33 = vor.u32 %v3915_v25, %v2802_v26  ;;  %v3049_v34 = vor.u32 %v3978_v28, %v3048_v24  ;;  %v3040_v36 = vld [vmem:[#allocation2 + $0x220] sm:$0xf] }
  0x31   :  { %875 = vmatpush.bf16.msrb.mxu2 %v3209_v43  ;;  %813 = vmatmul.bf16.vlgmr.msra.gmra.mxu1 %v4403_v8  ;;  %v4010_v32 = vld [vmem:[#allocation2 + $0x334] sm:$0xf0]  ;;  %v3113_v35 = vor.u32 %v3994_v30, %v3112_v29  ;;  %v3913_v37 = vld [vmem:[#allocation2 + $0x34] sm:$0xf]  ;;  %v2794_v38 = vld [vmem:[#allocation2 + $0x38] sm:$0xf0] }
  0x32   :  { %841 = vmatmul.bf16.vlgmr.msra.gmra.mxu3 %v4412_v20  ;;  %v3177_v39 = vor.u32 %v4010_v32, %v3176_v31  ;;  %v3976_v40 = vld [vmem:[#allocation2 + $0x224] sm:$0xf0]  ;;  %v3104_v41 = vld [vmem:[#allocation2 + $0x2a0] sm:$0xf]  ;;  %v2797_v45 = vor.u32 %v3913_v37, %v2794_v38  ;;  %v3032_v48 = vld [vmem:[#allocation2 + $0x210] sm:$0xf] }
  0x33   :  { %889 = vmatpush.bf16.msrb.mxu3 %v2829_v51  ;;  %848 = vmatpush.bf16.msrb.mxu0 %v3073_v56  ;;  %v3992_v42 = vld [vmem:[#allocation2 + $0x2a4] sm:$0xf0]  ;;  %v3168_v43 = vld [vmem:[#allocation2 + $0x320] sm:$0xf]  ;;  %v3041_v46 = vor.u32 %v3976_v40, %v3040_v36  ;;  %v3911_v49 = vld [vmem:[#allocation2 + $0x24] sm:$0xf] }
  0x34   :  { %862 = vmatpush.bf16.msrb.mxu1 %v3137_v57  ;;  %v4008_v44 = vld [vmem:[#allocation2 + $0x324] sm:$0xf0]  ;;  %v3105_v47 = vor.u32 %v3992_v42, %v3104_v41  ;;  %v2786_v50 = vld [vmem:[#allocation2 + $0x28] sm:$0xf0]  ;;  %v3974_v52 = vld [vmem:[#allocation2 + $0x214] sm:$0xf0] }
  0x35   :  { %876 = vmatpush.bf16.msrb.mxu2 %v3201_v62  ;;  %v3169_v51 = vor.u32 %v4008_v44, %v3168_v43  ;;  %v3096_v54 = vld [vmem:[#allocation2 + $0x290] sm:$0xf]  ;;  %v3990_v55 = vld [vmem:[#allocation2 + $0x294] sm:$0xf0]  ;;  %v2789_v58 = vor.u32 %v3911_v49, %v2786_v50  ;;  %v3024_v59 = vld [vmem:[#allocation2 + $0x200] sm:$0xf]  ;;  %v3033_v0 = vor.u32 %v3974_v52, %v3032_v48 }
  0x36   :  { %v3160_v56 = vld [vmem:[#allocation2 + $0x310] sm:$0xf]  ;;  %v4006_v57 = vld [vmem:[#allocation2 + $0x314] sm:$0xf0]  ;;  %v3972_v60 = vld [vmem:[#allocation2 + $0x204] sm:$0xf0]  ;;  %v3097_v1 = vor.u32 %v3990_v55, %v3096_v54 }
  0x37   :  { %890 = vmatpush.bf16.msrb.mxu3 %v2821_v5  ;;  %849 = vmatpush.bf16.msrb.mxu0 %v3065_v9  ;;  %v3088_v62 = vld [vmem:[#allocation2 + $0x280] sm:$0xf]  ;;  %v3988_v63 = vld [vmem:[#allocation2 + $0x284] sm:$0xf0]  ;;  %v3909_v4 = vld [vmem:[#allocation2 + $0x14] sm:$0xf]  ;;  %v3161_v6 = vor.u32 %v4006_v57, %v3160_v56  ;;  %v3025_v19 = vor.u32 %v3972_v60, %v3024_v59 }
  0x38   :  { %863 = vmatpush.bf16.msrb.mxu1 %v3129_v10  ;;  %v3152_v2 = vld [vmem:[#allocation2 + $0x300] sm:$0xf]  ;;  %v4004_v3 = vld [vmem:[#allocation2 + $0x304] sm:$0xf0]  ;;  %v2778_v5 = vld [vmem:[#allocation2 + $0x18] sm:$0xf0] }
  0x39   :  { %877 = vmatpush.bf16.msrb.mxu2 %v3193_v14  ;;  %v3937_v7 = vld [vmem:[#allocation2 + $0xf4] sm:$0xf]  ;;  %v2890_v9 = vld [vmem:[#allocation2 + $0xf8] sm:$0xf0]  ;;  %v2756_v12 = vld [vmem:[%s4938_s0 + $0x10] sm:$0xf]  ;;  %v2781_v14 = vor.u32 %v3909_v4, %v2778_v5  ;;  %v3153_v25 = vor.u32 %v4004_v3, %v3152_v2 }
  0x3a   :  { %v3953_v10 = vld [vmem:[#allocation2 + $0x174] sm:$0xf]  ;;  %v2954_v11 = vld [vmem:[#allocation2 + $0x178] sm:$0xf0]  ;;  %v3905_v13 = vld [vmem:[%s4938_s0 + $0x28] sm:$0xf0]  ;;  %v2893_v26 = vor.u32 %v3937_v7, %v2890_v9 }
  0x3b   :  { %891 = vmatpush.bf16.msrb.mxu3 %v2813_v21  ;;  %850 = vmatpush.bf16.msrb.mxu0 %v3057_v22  ;;  %v2764_v15 = vld [vmem:[%s4938_s0 + $0x18] sm:$0xf]  ;;  %v3906_v16 = vld [vmem:[%s4938_s0 + $0x30] sm:$0xf0]  ;;  %v3018_v18 = vld [vmem:[#allocation2 + $0x1f8] sm:$0xf0]  ;;  %v3089_v21 = vor.u32 %v3988_v63, %v3088_v62  ;;  %v2957_v30 = vor.u32 %v3953_v10, %v2954_v11 }
  0x3c   :  { %864 = vmatpush.bf16.msrb.mxu1 %v3121_v23  ;;  %v3969_v17 = vld [vmem:[#allocation2 + $0x1f4] sm:$0xf]  ;;  %v2758_v23 = vld [vmem:[%s4938_s0 + $0x2c] sm:$0xf0]  ;;  %v3907_v24 = vld [vmem:[#allocation2 + $0x4] sm:$0xf]  ;;  %v4437_v40 = vor.u32 %v3906_v16, %v2764_v15 }
  0x3d   :  { %878 = vmatpush.bf16.msrb.mxu2 %v3185_v27  ;;  %v3902_v22 = vld [vmem:[%s4938_s0 + $0x14] sm:$0xf]  ;;  %v2770_v27 = vld [vmem:[#allocation2 + $0x8] sm:$0xf0]  ;;  %v3935_v28 = vld [vmem:[#allocation2 + $0xe4] sm:$0xf]  ;;  %v3021_v31 = vor.u32 %v3969_v17, %v3018_v18 }
  0x3e   :  { %v2882_v29 = vld [vmem:[#allocation2 + $0xe8] sm:$0xf0]  ;;  %v3951_v32 = vld [vmem:[#allocation2 + $0x164] sm:$0xf]  ;;  %v4435_v36 = vor.u32 %v3902_v22, %v2758_v23  ;;  %v2773_v41 = vor.u32 %v3907_v24, %v2770_v27  ;;  %v3933_v44 = vld [vmem:[#allocation2 + $0xd4] sm:$0xf] }
  0x3f   :  { %892 = vmatpush.bf16.msrb.mxu3 %v2805_v33  ;;  %851 = vmatpush.bf16.msrb.mxu0 %v3049_v34  ;;  %v3985_v33 = vld [vmem:[#allocation2 + $0x274] sm:$0xf]  ;;  %v3082_v34 = vld [vmem:[#allocation2 + $0x278] sm:$0xf0]  ;;  %v2946_v37 = vld [vmem:[#allocation2 + $0x168] sm:$0xf0]  ;;  %v2885_v42 = vor.u32 %v3935_v28, %v2882_v29 }
  0x40   :  { %865 = vmatpush.bf16.msrb.mxu1 %v3113_v35  ;;  %v4433_v35 = vor.u32 %v3905_v13, %v2756_v12  ;;  %v3967_v38 = vld [vmem:[#allocation2 + $0x1e4] sm:$0xf]  ;;  %v3085_v43 = vor.u32 %v3985_v33, %v3082_v34  ;;  %v3949_v48 = vld [vmem:[#allocation2 + $0x154] sm:$0xf]  ;;  %v3074_v50 = vld [vmem:[#allocation2 + $0x268] sm:$0xf0] }
  0x41   :  { %879 = vmatpush.bf16.msrb.mxu2 %v3177_v39  ;;  %v3010_v39 = vld [vmem:[#allocation2 + $0x1e8] sm:$0xf0]  ;;  %v3983_v49 = vld [vmem:[#allocation2 + $0x264] sm:$0xf]  ;;  %v3965_v52 = vld [vmem:[#allocation2 + $0x1d4] sm:$0xf] }
  0x42   :  { %v3002_v54 = vld [vmem:[#allocation2 + $0x1d8] sm:$0xf0]  ;;  %v3077_v56 = vor.u32 %v3983_v49, %v3074_v50  ;;  %v3931_v57 = vld [vmem:[#allocation2 + $0xc4] sm:$0xf]  ;;  %v3981_v63 = vld [vmem:[#allocation2 + $0x254] sm:$0xf] }
  0x43   :  { %893 = vmatpush.bf16.msrb.mxu3 %v2797_v45  ;;  %852 = vmatpush.bf16.msrb.mxu0 %v3041_v46  ;;  %v2874_v45 = vld [vmem:[#allocation2 + $0xd8] sm:$0xf0]  ;;  %v2949_v46 = vor.u32 %v3951_v32, %v2946_v37  ;;  %v3005_v60 = vor.u32 %v3965_v52, %v3002_v54  ;;  %v3947_v62 = vld [vmem:[#allocation2 + $0x144] sm:$0xf]  ;;  %v2994_v3 = vld [vmem:[#allocation2 + $0x1c8] sm:$0xf0] }
  0x44   :  { %866 = vmatpush.bf16.msrb.mxu1 %v3105_v47  ;;  %v3013_v47 = vor.u32 %v3967_v38, %v3010_v39  ;;  %v2877_v55 = vor.u32 %v3933_v44, %v2874_v45  ;;  %v3963_v2 = vld [vmem:[#allocation2 + $0x1c4] sm:$0xf]  ;;  %v2858_v7 = vld [vmem:[#allocation2 + $0xb8] sm:$0xf0]  ;;  %v3945_v11 = vld [vmem:[#allocation2 + $0x134] sm:$0xf] }
  0x45   :  { %880 = vmatpush.bf16.msrb.mxu2 %v3169_v51  ;;  %v2938_v51 = vld [vmem:[#allocation2 + $0x158] sm:$0xf0]  ;;  %v2997_v10 = vor.u32 %v3963_v2, %v2994_v3  ;;  %v3979_v12 = vld [vmem:[#allocation2 + $0x244] sm:$0xf]  ;;  %v3058_v13 = vld [vmem:[#allocation2 + $0x248] sm:$0xf0] }
  0x46   :  { %v2941_v59 = vor.u32 %v3949_v48, %v2938_v51  ;;  %v3961_v15 = vld [vmem:[#allocation2 + $0x1b4] sm:$0xf]  ;;  %v2986_v16 = vld [vmem:[#allocation2 + $0x1b8] sm:$0xf0]  ;;  %v3927_v17 = vld [vmem:[#allocation2 + $0xa4] sm:$0xf]  ;;  %v3061_v18 = vor.u32 %v3979_v12, %v3058_v13 }
  0x47   :  { %894 = vmatpush.bf16.msrb.mxu3 %v2789_v58  ;;  %853 = vmatpush.bf16.msrb.mxu0 %v3033_v0  ;;  %v2866_v58 = vld [vmem:[#allocation2 + $0xc8] sm:$0xf0]  ;;  %v3066_v0 = vld [vmem:[#allocation2 + $0x258] sm:$0xf0]  ;;  %v3977_v22 = vld [vmem:[#allocation2 + $0x234] sm:$0xf]  ;;  %v2989_v24 = vor.u32 %v3961_v15, %v2986_v16 }
  0x48   :  { %867 = vmatpush.bf16.msrb.mxu1 %v3097_v1  ;;  %v2930_v1 = vld [vmem:[#allocation2 + $0x148] sm:$0xf0]  ;;  %v2869_v4 = vor.u32 %v3931_v57, %v2866_v58  ;;  %v3069_v5 = vor.u32 %v3981_v63, %v3066_v0  ;;  %v3959_v27 = vld [vmem:[#allocation2 + $0x1a4] sm:$0xf]  ;;  %v2842_v32 = vld [vmem:[#allocation2 + $0x98] sm:$0xf0] }
  0x49   :  { %881 = vmatpush.bf16.msrb.mxu2 %v3161_v6  ;;  %v3929_v6 = vld [vmem:[#allocation2 + $0xb4] sm:$0xf]  ;;  %v2933_v9 = vor.u32 %v3947_v62, %v2930_v1  ;;  %v2978_v28 = vld [vmem:[#allocation2 + $0x1a8] sm:$0xf0]  ;;  %v3975_v38 = vld [vmem:[#allocation2 + $0x224] sm:$0xf] }
  0x4a   :  { %v2981_v34 = vor.u32 %v3959_v27, %v2978_v28  ;;  %v3941_v37 = vld [vmem:[#allocation2 + $0x114] sm:$0xf]  ;;  %v3042_v39 = vld [vmem:[#allocation2 + $0x228] sm:$0xf0]  ;;  %v3939_v48 = vld [vmem:[#allocation2 + $0x104] sm:$0xf] }
  0x4b   :  { %895 = vmatpush.bf16.msrb.mxu3 %v2781_v14  ;;  %854 = vmatpush.bf16.msrb.mxu0 %v3025_v19  ;;  %v2922_v14 = vld [vmem:[#allocation2 + $0x138] sm:$0xf0]  ;;  %v2850_v19 = vld [vmem:[#allocation2 + $0xa8] sm:$0xf0]  ;;  %v3045_v45 = vor.u32 %v3975_v38, %v3042_v39  ;;  %v3973_v52 = vld [vmem:[#allocation2 + $0x214] sm:$0xf] }
  0x4c   :  { %868 = vmatpush.bf16.msrb.mxu1 %v3089_v21  ;;  %v3943_v21 = vld [vmem:[#allocation2 + $0x124] sm:$0xf]  ;;  %v2925_v23 = vor.u32 %v3945_v11, %v2922_v14  ;;  %v2853_v29 = vor.u32 %v3927_v17, %v2850_v19  ;;  %v2898_v51 = vld [vmem:[#allocation2 + $0x108] sm:$0xf0]  ;;  %v3034_v54 = vld [vmem:[#allocation2 + $0x218] sm:$0xf0] }
  0x4d   :  { %882 = vmatpush.bf16.msrb.mxu2 %v3153_v25  ;;  %v3050_v25 = vld [vmem:[#allocation2 + $0x238] sm:$0xf0]  ;;  %v4017_v57 = vld [vmem:[#allocation2 + $0x374] sm:$0xf]  ;;  %v3037_v63 = vor.u32 %v3973_v52, %v3034_v54  ;;  %v2901_v0 = vor.u32 %v3939_v48, %v2898_v51  ;;  %v3971_v2 = vld [vmem:[#allocation2 + $0x204] sm:$0xf] }
  0x4e   :  { %855 = vmatmul.bf16.vlgmr.msrb.gmra.mxu0 %v4433_v35  ;;  %v3210_v58 = vld [vmem:[#allocation2 + $0x378] sm:$0xf0]  ;;  %v3026_v3 = vld [vmem:[#allocation2 + $0x208] sm:$0xf0]  ;;  %v3997_v14 = vld [vmem:[#allocation2 + $0x2d4] sm:$0xf] }
  0x4f   :  { %903 = vmatpush.bf16.msra.mxu0 %v2893_v26  ;;  %869 = vmatmul.bf16.vlgmr.msrb.gmra.mxu1 %v4435_v36  ;;  %v2914_v26 = vld [vmem:[#allocation2 + $0x128] sm:$0xf0]  ;;  %v3029_v11 = vor.u32 %v3971_v2, %v3026_v3  ;;  %v3130_v15 = vld [vmem:[#allocation2 + $0x2d8] sm:$0xf0]  ;;  %v4013_v16 = vld [vmem:[#allocation2 + $0x354] sm:$0xf] }
  0x50   :  { %917 = vmatpush.bf16.msra.mxu1 %v2957_v30  ;;  %883 = vmatmul.bf16.vlgmr.msrb.gmra.mxu2 %v4437_v40  ;;  %v3053_v30 = vor.u32 %v3977_v22, %v3050_v25  ;;  %v2917_v33 = vor.u32 %v3943_v21, %v2914_v26  ;;  %v3194_v17 = vld [vmem:[#allocation2 + $0x358] sm:$0xf0]  ;;  %v3995_v19 = vld [vmem:[#allocation2 + $0x2c4] sm:$0xf]  ;;  %v3122_v21 = vld [vmem:[#allocation2 + $0x2c8] sm:$0xf0] }
  0x51   :  { %931 = vmatpush.bf16.msra.mxu2 %v3021_v31  ;;  %896 = vmatpush.bf16.msrb.mxu3 %v2773_v41  ;;  %v3925_v31 = vld [vmem:[#allocation2 + $0x94] sm:$0xf]  ;;  %v2906_v41 = vld [vmem:[#allocation2 + $0x118] sm:$0xf0]  ;;  %v4011_v22 = vld [vmem:[#allocation2 + $0x344] sm:$0xf] }
  0x52   :  { %v2845_v44 = vor.u32 %v3925_v31, %v2842_v32  ;;  %v2909_v49 = vor.u32 %v3941_v37, %v2906_v41  ;;  %v3993_v25 = vld [vmem:[#allocation2 + $0x2b4] sm:$0xf]  ;;  %v3114_v26 = vld [vmem:[#allocation2 + $0x2b8] sm:$0xf0]  ;;  %v4007_v31 = vld [vmem:[#allocation2 + $0x324] sm:$0xf] }
  0x53   :  { %904 = vmatpush.bf16.msra.mxu0 %v2885_v42  ;;  %v3957_v42 = vld [vmem:[#allocation2 + $0x194] sm:$0xf]  ;;  %v3117_v28 = vor.u32 %v3993_v25, %v3114_v26  ;;  %v3170_v32 = vld [vmem:[#allocation2 + $0x328] sm:$0xf0]  ;;  %v3098_v37 = vld [vmem:[#allocation2 + $0x298] sm:$0xf0] }
  0x54   :  { %918 = vmatpush.bf16.msra.mxu1 %v2949_v46  ;;  %897 = vmatmul.bf16.vlgmr.msrb.gmra.mxu3 %v4385_v53  ;;  %v2861_v53 = vor.u32 %v3929_v6, %v2858_v7  ;;  %v3923_v46 = vld [vmem:[#allocation2 + $0x84] sm:$0xf]  ;;  %v3138_v7 = vld [vmem:[#allocation2 + $0x2e8] sm:$0xf0]  ;;  %v4009_v27 = vld [vmem:[#allocation2 + $0x334] sm:$0xf] }
  0x55   :  { %945 = vmatpush.bf16.msra.mxu3 %v3085_v43  ;;  %932 = vmatpush.bf16.msra.mxu2 %v3013_v47  ;;  %v2970_v43 = vld [vmem:[#allocation2 + $0x198] sm:$0xf0]  ;;  %v2834_v47 = vld [vmem:[#allocation2 + $0x88] sm:$0xf0]  ;;  %v3999_v6 = vld [vmem:[#allocation2 + $0x2e4] sm:$0xf] }
  0x56   :  { %v2973_v50 = vor.u32 %v3957_v42, %v2970_v43  ;;  %v2837_v62 = vor.u32 %v3923_v46, %v2834_v47  ;;  %v3141_v12 = vor.u32 %v3999_v6, %v3138_v7  ;;  %v4005_v38 = vld [vmem:[#allocation2 + $0x314] sm:$0xf]  ;;  %v3162_v39 = vld [vmem:[#allocation2 + $0x318] sm:$0xf0]  ;;  %v3987_v43 = vld [vmem:[#allocation2 + $0x284] sm:$0xf] }
  0x57   :  { %905 = vmatpush.bf16.msra.mxu0 %v2877_v55  ;;  %v4001_v55 = vld [vmem:[#allocation2 + $0x2f4] sm:$0xf]  ;;  %v3165_v42 = vor.u32 %v4005_v38, %v3162_v39  ;;  %v3154_v46 = vld [vmem:[#allocation2 + $0x308] sm:$0xf0]  ;;  %v991_v26 = vld [vmem:[%s4939_s1] sm:$0xff] }
  0x58   :  { %919 = vmatpush.bf16.msra.mxu1 %v2941_v59  ;;  %v3955_v59 = vld [vmem:[#allocation2 + $0x184] sm:$0xf]  ;;  %v4024_v51 = vld [vmem:[%s4942_s4 + $0x28] sm:$0xff]  ;;  %v4021_v52 = vld [vmem:[%s4942_s4 + $0x10] sm:$0xff] }
  0x59   :  { %946 = vmatpush.bf16.msra.mxu3 %v3077_v56  ;;  %933 = vmatpush.bf16.msra.mxu2 %v3005_v60  ;;  %v3146_v56 = vld [vmem:[#allocation2 + $0x2f8] sm:$0xf0]  ;;  %v2962_v60 = vld [vmem:[#allocation2 + $0x188] sm:$0xf0]  ;;  %v4033_v25 = vld [vmem:[%s4942_s4 + $0x70] sm:$0xff] }
  0x5a   :  { %v3149_v1 = vor.u32 %v4001_v55, %v3146_v56  ;;  %v4470_v55 = vld [vmem:[%s4947_s9] sm:$0x3] }
  0x5b   :  { %906 = vmatpush.bf16.msra.mxu0 %v2869_v4  ;;  %v3213_v4 = vor.u32 %v4017_v57, %v3210_v58  ;;  %v4020_v57 = vld [vmem:[%s4942_s4 + $0x8] sm:$0xff]  ;;  %v191_v58 = vperm.slane %v4470_v55, 0 }
  0x5c   :  { %920 = vmatpush.bf16.msra.mxu1 %v2933_v9  ;;  %v4015_v9 = vld [vmem:[#allocation2 + $0x364] sm:$0xf] }
  0x5d   :  { %947 = vmatpush.bf16.msra.mxu3 %v3069_v5  ;;  %934 = vmatpush.bf16.msra.mxu2 %v2997_v10  ;;  %v2965_v5 = vor.u32 %v3955_v59, %v2962_v60  ;;  %v3202_v10 = vld [vmem:[#allocation2 + $0x368] sm:$0xf0]  ;;  %v4019_v60 = vld [vmem:[%s4942_s4] sm:$0xff] }
  0x5e   :  { %v3205_v13 = vor.u32 %v4015_v9, %v3202_v10 }
  0x5f   :  { %907 = vmatpush.bf16.msra.mxu0 %v2861_v53  ;;  %v3133_v53 = vor.u32 %v3997_v14, %v3130_v15 }
  0x60   :  { %921 = vmatpush.bf16.msra.mxu1 %v2925_v23  ;;  %v3186_v23 = vld [vmem:[#allocation2 + $0x348] sm:$0xf0] }
  0x61   :  { %948 = vmatpush.bf16.msra.mxu3 %v3061_v18  ;;  %935 = vmatpush.bf16.msra.mxu2 %v2989_v24  ;;  %v3197_v18 = vor.u32 %v4013_v16, %v3194_v17  ;;  %v3125_v24 = vor.u32 %v3995_v19, %v3122_v21  ;;  %v4034_v21 = vld [vmem:[%s4942_s4 + $0x78] sm:$0xff] }
  0x63   :  { %908 = vmatpush.bf16.msra.mxu0 %v2853_v29  ;;  %v3991_v29 = vld [vmem:[#allocation2 + $0x2a4] sm:$0xf] }
  0x64   :  { %922 = vmatpush.bf16.msra.mxu1 %v2917_v33  ;;  %v3173_v33 = vor.u32 %v4007_v31, %v3170_v32  ;;  %v4031_v31 = vld [vmem:[%s4942_s4 + $0x60] sm:$0xff]  ;;  %v4030_v32 = vld [vmem:[%s4942_s4 + $0x58] sm:$0xff] }
  0x65   :  { %949 = vmatpush.bf16.msra.mxu3 %v3053_v30  ;;  %936 = vmatpush.bf16.msra.mxu2 %v2981_v34  ;;  %v3106_v30 = vld [vmem:[#allocation2 + $0x2a8] sm:$0xf0]  ;;  %v3989_v34 = vld [vmem:[#allocation2 + $0x294] sm:$0xf] }
  0x66   :  { %v3101_v41 = vor.u32 %v3989_v34, %v3098_v37  ;;  %v4028_v34 = vld [vmem:[%s4942_s4 + $0x48] sm:$0xff]  ;;  %v192_v37 = vperm.slane %v4470_v55, 1 }
  0x67   :  { %909 = vmatpush.bf16.msra.mxu0 %v2845_v44  ;;  %v3090_v44 = vld [vmem:[#allocation2 + $0x288] sm:$0xf0] }
  0x68   :  { %923 = vmatpush.bf16.msra.mxu1 %v2909_v49  ;;  %v3093_v47 = vor.u32 %v3987_v43, %v3090_v44  ;;  %v4026_v49 = vld [vmem:[%s4942_s4 + $0x38] sm:$0xff] }
  0x69   :  { %950 = vmatpush.bf16.msra.mxu3 %v3045_v45  ;;  %937 = vmatpush.bf16.msra.mxu2 %v2973_v50  ;;  %v4003_v45 = vld [vmem:[#allocation2 + $0x304] sm:$0xf]  ;;  %v4025_v50 = vld [vmem:[%s4942_s4 + $0x30] sm:$0xff] }
  0x6a   :  { %v3157_v48 = vor.u32 %v4003_v45, %v3154_v46 }
  0x6b   :  { %910 = vmatpush.bf16.msra.mxu0 %v2837_v62 }
  0x6c   :  { %924 = vmatpush.bf16.msra.mxu1 %v2901_v0 }
  0x6d   :  { %951 = vmatpush.bf16.msra.mxu3 %v3037_v63  ;;  %938 = vmatpush.bf16.msra.mxu2 %v2965_v5 }
  0x6e   :  { %911 = vmatmul.bf16.vlgmr.msra.gmra.mxu0 %v4403_v8  ;;  %v3189_v8 = vor.u32 %v4011_v22, %v3186_v23 }
  0x6f   :  { %959 = vmatpush.bf16.msrb.mxu0 %v3149_v1  ;;  %925 = vmatmul.bf16.vlgmr.msra.gmra.mxu1 %v4393_v61  ;;  %v3178_v61 = vld [vmem:[#allocation2 + $0x338] sm:$0xf0] }
  0x70   :  { %973 = vmatpush.bf16.msrb.mxu1 %v3213_v4  ;;  %939 = vmatmul.bf16.vlgmr.msra.gmra.mxu2 %v4412_v20  ;;  %v3181_v20 = vor.u32 %v4009_v27, %v3178_v61  ;;  %v993_v27 = vld [vmem:[%s4939_s1 + $0x10] sm:$0xff] }
  0x71   :  { %952 = vmatpush.bf16.msra.mxu3 %v3029_v11  ;;  %1133 = vmatpush.bf16.msrb.mxu2 %v4026_v49 }
  0x73   :  { %960 = vmatpush.bf16.msrb.mxu0 %v3141_v12 }
  0x74   :  { %974 = vmatpush.bf16.msrb.mxu1 %v3205_v13  ;;  %953 = vmatmul.bf16.vlgmr.msra.gmra.mxu3 %v4433_v35  ;;  %v3109_v35 = vor.u32 %v3991_v29, %v3106_v30 }
  0x75   :  { %1134 = vmatpush.bf16.msrb.mxu2 %v4025_v50  ;;  %1147 = vmatpush.bf16.msrb.mxu3 %v4034_v21 }
  0x77   :  { %961 = vmatpush.bf16.msrb.mxu0 %v3133_v53 }
  0x78   :  { %975 = vmatpush.bf16.msrb.mxu1 %v3197_v18 }
  0x79   :  { %1135 = vmatpush.bf16.msrb.mxu2 %v4024_v51  ;;  %1148 = vmatpush.bf16.msrb.mxu3 %v4033_v25  ;;  %v3322_v25 = vld [vmem:[%s4943_s5 + $0x58] sm:$0xf0] }
  0x7b   :  { %962 = vmatpush.bf16.msrb.mxu0 %v3125_v24 }
  0x7c   :  { %976 = vmatpush.bf16.msrb.mxu1 %v3189_v8 }
  0x7f   :  { %963 = vmatpush.bf16.msrb.mxu0 %v3117_v28  ;;  %v4032_v28 = vld [vmem:[%s4942_s4 + $0x68] sm:$0xff] }
  0x80   :  { %977 = vmatpush.bf16.msrb.mxu1 %v3181_v20  ;;  %1149 = vmatpush.bf16.msrb.mxu3 %v4032_v28  ;;  %v4044_v28 = vld [vmem:[%s4943_s5 + $0x44] sm:$0xf0] }
  0x83   :  { %964 = vmatpush.bf16.msrb.mxu0 %v3109_v35 }
  0x84   :  { %978 = vmatpush.bf16.msrb.mxu1 %v3173_v33  ;;  %1150 = vmatpush.bf16.msrb.mxu3 %v4031_v31  ;;  %v4029_v33 = vld [vmem:[%s4942_s4 + $0x50] sm:$0xff] }
  0x87   :  { %965 = vmatpush.bf16.msrb.mxu0 %v3101_v41  ;;  %v4027_v41 = vld [vmem:[%s4942_s4 + $0x40] sm:$0xff] }
  0x88   :  { %979 = vmatpush.bf16.msrb.mxu1 %v3165_v42  ;;  %1151 = vmatpush.bf16.msrb.mxu3 %v4030_v32  ;;  %v3304_v32 = vld [vmem:[%s4943_s5 + $0x30] sm:$0xf] }
  0x8b   :  { %966 = vmatpush.bf16.msrb.mxu0 %v3093_v47 }
  0x8c   :  { %980 = vmatpush.bf16.msrb.mxu1 %v3157_v48  ;;  %1152 = vmatpush.bf16.msrb.mxu3 %v4029_v33  ;;  %v4041_v33 = vld [vmem:[%s4943_s5 + $0x34] sm:$0xf] }
  0x8e   :  { %967 = vmatmul.bf16.vlgmr.msrb.gmra.mxu0 %v4435_v36  ;;  %v4023_v36 = vld [vmem:[%s4942_s4 + $0x20] sm:$0xff] }
  0x8f   :  { %981 = vmatmul.bf16.vlgmr.msrb.gmra.mxu1 %v4437_v40  ;;  %1136 = vmatpush.bf16.msrb.mxu2 %v4023_v36  ;;  %v4022_v40 = vld [vmem:[%s4942_s4 + $0x18] sm:$0xff] }
  0x90   :  { %1153 = vmatpush.bf16.msrb.mxu3 %v4028_v34 }
  0x93   :  { %1137 = vmatpush.bf16.msrb.mxu2 %v4022_v40 }
  0x94   :  { %1154 = vmatpush.bf16.msrb.mxu3 %v4027_v41  ;;  %v4040_v41 = vld [vmem:[%s4943_s5 + $0x24] sm:$0xf0] }
  0x97   :  { %1138 = vmatpush.bf16.msrb.mxu2 %v4021_v52 }
  0x9b   :  { %1139 = vmatpush.bf16.msrb.mxu2 %v4020_v57 }
  0x9f   :  { %1140 = vmatpush.bf16.msrb.mxu2 %v4019_v60 }
  0xab   :  { %v800_v54 = vpop.f32.mrf.mxu0 }
  0xac   :  { %v801_v62 = vadd.f32 %v800_v54, %v191_v58 }
  0xae   :  { %v814_v56 = vpop.f32.mrf.mxu1 }
  0xaf   :  { %v815_v1 = vadd.f32 %v814_v56, %v801_v62 }
  0xb3   :  { %v828_v59 = vpop.f32.mrf.mxu2  ;;  %v802_v63 = vpop.f32.mrf.mxu0 }
  0xb4   :  { %v829_v3 = vadd.f32 %v828_v59, %v815_v1  ;;  %v803_v4 = vadd.f32 %v802_v63, %v191_v58 }
  0xb5   :  { %v842_v2 = vpop.f32.mrf.mxu3 }
  0xb6   :  { %v816_v0 = vpop.f32.mrf.mxu1  ;;  %v843_v7 = vadd.f32 %v842_v2, %v829_v3 }
  0xb7   :  { %v817_v6 = vadd.f32 %v816_v0, %v803_v4  ;;  %v992_v4 = vld [vmem:[%s4939_s1 + $0x8] sm:$0xff] }
  0xbb   :  { %v830_v5 = vpop.f32.mrf.mxu2 }
  0xbc   :  { %v831_v11 = vadd.f32 %v830_v5, %v817_v6  ;;  %v994_v5 = vld [vmem:[%s4939_s1 + $0x18] sm:$0xff] }
  0xbd   :  { %v844_v13 = vpop.f32.mrf.mxu3 }
  0xbe   :  { %v845_v16 = vadd.f32 %v844_v13, %v831_v11  ;;  %v3336_v11 = vld [vmem:[%s4943_s5 + $0x70] sm:$0xf]  ;;  %v4049_v13 = vld [vmem:[%s4943_s5 + $0x74] sm:$0xf] }
  0xcb   :  { %v856_v9 = vpop.f32.mrf.mxu0 }
  0xcc   :  { %v870_v10 = vpop.f32.mrf.mxu1  ;;  %v857_v12 = vadd.f32 %v856_v9, %v843_v7 }
  0xce   :  { %v871_v15 = vadd.f32 %v870_v10, %v857_v12  ;;  %v4050_v12 = vld [vmem:[%s4943_s5 + $0x74] sm:$0xf0] }
  0xd3   :  { %v884_v14 = vpop.f32.mrf.mxu2  ;;  %v858_v17 = vpop.f32.mrf.mxu0 }
  0xd4   :  { %v859_v53 = vadd.f32 %v858_v17, %v845_v16  ;;  %v872_v18 = vpop.f32.mrf.mxu1  ;;  %v885_v19 = vadd.f32 %v884_v14, %v871_v15  ;;  %v3337_v14 = vor.u32 %v4050_v12, %v3336_v11  ;;  %v3338_v15 = vld [vmem:[%s4943_s5 + $0x78] sm:$0xf0]  ;;  %v3328_v16 = vld [vmem:[%s4943_s5 + $0x60] sm:$0xf]  ;;  %v4048_v17 = vld [vmem:[%s4943_s5 + $0x64] sm:$0xf0] }
  0xd5   :  { %v3329_v21 = vor.u32 %v4048_v17, %v3328_v16  ;;  %v4054_v11 = vld [vmem:[%s4944_s6 + $0x18] sm:$0xff]  ;;  %v4053_v12 = vld [vmem:[%s4944_s6 + $0x10] sm:$0xff] }
  0xd6   :  { %v873_v22 = vadd.f32 %v872_v18, %v859_v53  ;;  %v987_v24 = vmax.f32 %v885_v19, 0.0  ;;  %v3341_v53 = vor.u32 %v4049_v13, %v3338_v15  ;;  %v4047_v18 = vld [vmem:[%s4943_s5 + $0x64] sm:$0xf]  ;;  %v3330_v19 = vld [vmem:[%s4943_s5 + $0x68] sm:$0xf0]  ;;  %1266 = vmatpush.bf16.msra.mxu0 %v3337_v14 }
  0xd7   :  { %v898_v35 = vpop.f32.mrf.mxu3  ;;  %v4052_v13 = vld [vmem:[%s4944_s6 + $0x8] sm:$0xff]  ;;  %v4051_v14 = vld [vmem:[%s4944_s6] sm:$0xff] }
  0xd8   :  { %v995_v20 = vmul.f32 %v991_v26, %v987_v24  ;;  %v899_v43 = vadd.f32 %v898_v35, %v192_v37  ;;  %1280 = vmatpush.bf16.msra.mxu1 %v3341_v53  ;;  %v4046_v24 = vld [vmem:[%s4943_s5 + $0x54] sm:$0xf0]  ;;  %v1180_v15 = vld [vmem:[%s4947_s9 + $0x3] sm:$0x3]  ;;  %v3432_v53 = vld [vmem:[%s4945_s7 + $0x70] sm:$0xf] }
  0xd9   :  { %v4042_v35 = vld [vmem:[%s4943_s5 + $0x34] sm:$0xf0]  ;;  %v1182_v16 = vperm.slane %v1180_v15, 0  ;;  %v1183_v17 = vperm.slane %v1180_v15, 1  ;;  %v3386_v15 = vld [vmem:[%s4945_s7 + $0x18] sm:$0xf0] }
  0xda   :  { %1267 = vmatpush.bf16.msra.mxu0 %v3329_v21  ;;  %v3305_v34 = vor.u32 %v4042_v35, %v3304_v32  ;;  %v4069_v35 = vld [vmem:[%s4945_s7 + $0x54] sm:$0xf] }
  0xdb   :  { %v886_v23 = vpop.f32.mrf.mxu2 }
  0xdc   :  { %v887_v8 = vadd.f32 %v886_v23, %v873_v22  ;;  %v3333_v22 = vor.u32 %v4047_v18, %v3330_v19  ;;  %v3320_v23 = vld [vmem:[%s4943_s5 + $0x50] sm:$0xf]  ;;  %v4074_v18 = vld [vmem:[%s4945_s7 + $0x74] sm:$0xf0]  ;;  %v4073_v19 = vld [vmem:[%s4945_s7 + $0x74] sm:$0xf] }
  0xdd   :  { %v3321_v26 = vor.u32 %v4046_v24, %v3320_v23  ;;  %v3433_v21 = vor.u32 %v4074_v18, %v3432_v53  ;;  %v3424_v23 = vld [vmem:[%s4945_s7 + $0x60] sm:$0xf]  ;;  %v4072_v24 = vld [vmem:[%s4945_s7 + $0x64] sm:$0xf0]  ;;  %v4059_v18 = vld [vmem:[%s4945_s7 + $0x4] sm:$0xf] }
  0xde   :  { %v989_v61 = vmax.f32 %v887_v8, 0.0  ;;  %v4045_v8 = vld [vmem:[%s4943_s5 + $0x54] sm:$0xf]  ;;  %1281 = vmatpush.bf16.msra.mxu1 %v3333_v22  ;;  %v3434_v22 = vld [vmem:[%s4945_s7 + $0x78] sm:$0xf0] }
  0xdf   :  { %v900_v42 = vpop.f32.mrf.mxu3  ;;  %1268 = vmatpush.bf16.msra.mxu0 %v3321_v26  ;;  %v3426_v26 = vld [vmem:[%s4945_s7 + $0x68] sm:$0xf0]  ;;  %1498 = vmatpush.bf16.msra.mxu3 %v3433_v21  ;;  %v4060_v53 = vld [vmem:[%s4945_s7 + $0x4] sm:$0xf0] }
  0xe0   :  { %v997_v29 = vmul.f32 %v993_v27, %v989_v61  ;;  %v901_v46 = vadd.f32 %v900_v42, %v192_v37  ;;  %v3325_v27 = vor.u32 %v4045_v8, %v3322_v25  ;;  %v3312_v61 = vld [vmem:[%s4943_s5 + $0x40] sm:$0xf]  ;;  %v3306_v37 = vld [vmem:[%s4943_s5 + $0x38] sm:$0xf0]  ;;  %v4039_v42 = vld [vmem:[%s4943_s5 + $0x24] sm:$0xf]  ;;  %v3437_v8 = vor.u32 %v4073_v19, %v3434_v22 }
  0xe1   :  { %v4071_v25 = vld [vmem:[%s4945_s7 + $0x64] sm:$0xf]  ;;  %v3378_v21 = vld [vmem:[%s4945_s7 + $0x8] sm:$0xf0] }
  0xe2   :  { %v999_v30 = vpack.c.bf16 %v997_v29, %v995_v20  ;;  %v4043_v20 = vld [vmem:[%s4943_s5 + $0x44] sm:$0xf]  ;;  %v3314_v29 = vld [vmem:[%s4943_s5 + $0x48] sm:$0xf0]  ;;  %1282 = vmatpush.bf16.msra.mxu1 %v3325_v27  ;;  %v3425_v27 = vor.u32 %v4072_v24, %v3424_v23  ;;  %v3381_v22 = vor.u32 %v4059_v18, %v3378_v21  ;;  %v3860_v23 = vld [vmem:[#allocation4 + $0x348] sm:$0xf] }
  0xe3   :  { %v3317_v31 = vor.u32 %v4043_v20, %v3314_v29  ;;  %v3429_v20 = vor.u32 %v4071_v25, %v3426_v26  ;;  %v3416_v29 = vld [vmem:[%s4945_s7 + $0x50] sm:$0xf]  ;;  %v4183_v24 = vld [vmem:[#allocation4 + $0x360] sm:$0xf0]  ;;  %v3862_v26 = vld [vmem:[#allocation4 + $0x364] sm:$0xf0] }
  0xe4   :  { %1141 = vmatmul.bf16.vlgmr.msrb.gmra.mxu2 %v999_v30  ;;  %v3313_v30 = vor.u32 %v4044_v28, %v3312_v61  ;;  %1499 = vmatpush.bf16.msra.mxu3 %v3425_v27  ;;  %v3861_v25 = vor.u32 %v4183_v24, %v3860_v23  ;;  %v3832_v27 = vld [vmem:[#allocation4 + $0x310] sm:$0xf] }
  0xe5   :  { %v3722_v21 = vld [vmem:[#allocation4 + $0x24c] sm:$0xf0] }
  0xe6   :  { %1269 = vmatpush.bf16.msra.mxu0 %v3313_v30  ;;  %1283 = vmatpush.bf16.msra.mxu1 %v3317_v31  ;;  %v4070_v30 = vld [vmem:[%s4945_s7 + $0x54] sm:$0xf0]  ;;  %v3496_v24 = vld [vmem:[#allocation4 + $0x70] sm:$0xf] }
  0xea   :  { %1270 = vmatpush.bf16.msra.mxu0 %v3305_v34 }
  0xeb   :  { %v912_v38 = vpop.f32.mrf.mxu0 }
  0xec   :  { %v926_v39 = vpop.f32.mrf.mxu1  ;;  %v913_v44 = vadd.f32 %v912_v38, %v899_v43  ;;  %v3309_v38 = vor.u32 %v4041_v33, %v3306_v37  ;;  %v3418_v33 = vld [vmem:[%s4945_s7 + $0x58] sm:$0xf0]  ;;  %v3417_v37 = vor.u32 %v4070_v30, %v3416_v29  ;;  %v3834_v29 = vld [vmem:[#allocation4 + $0x32c] sm:$0xf0]  ;;  %v3636_v30 = vld [vmem:[#allocation4 + $0x188] sm:$0xf] }
  0xee   :  { %v927_v48 = vadd.f32 %v926_v39, %v913_v44  ;;  %1284 = vmatpush.bf16.msra.mxu1 %v3309_v38  ;;  %v3296_v39 = vld [vmem:[%s4943_s5 + $0x20] sm:$0xf]  ;;  %v3298_v44 = vld [vmem:[%s4943_s5 + $0x28] sm:$0xf0]  ;;  %v3421_v38 = vor.u32 %v4069_v35, %v3418_v33  ;;  %1500 = vmatpush.bf16.msra.mxu3 %v3417_v37  ;;  %v3638_v33 = vld [vmem:[#allocation4 + $0x1a4] sm:$0xf0] }
  0xef   :  { %v3297_v43 = vor.u32 %v4040_v41, %v3296_v39  ;;  %v3408_v39 = vld [vmem:[%s4945_s7 + $0x40] sm:$0xf]  ;;  %v4068_v41 = vld [vmem:[%s4945_s7 + $0x44] sm:$0xf0]  ;;  %v4124_v35 = vld [vmem:[#allocation4 + $0x18c] sm:$0xf] }
  0xf1   :  { %1271 = vmatpush.bf16.msra.mxu0 %v3297_v43  ;;  %v3410_v43 = vld [vmem:[%s4945_s7 + $0x48] sm:$0xf0] }
  0xf3   :  { %v940_v45 = vpop.f32.mrf.mxu2  ;;  %v914_v47 = vpop.f32.mrf.mxu0 }
  0xf4   :  { %v928_v49 = vpop.f32.mrf.mxu1  ;;  %v915_v51 = vadd.f32 %v914_v47, %v901_v46  ;;  %v941_v36 = vadd.f32 %v940_v45, %v927_v48  ;;  %v3301_v45 = vor.u32 %v4039_v42, %v3298_v44  ;;  %v3288_v46 = vld [vmem:[%s4943_s5 + $0x10] sm:$0xf]  ;;  %v4038_v47 = vld [vmem:[%s4943_s5 + $0x14] sm:$0xf0]  ;;  %v4037_v48 = vld [vmem:[%s4943_s5 + $0x14] sm:$0xf] }
  0xf5   :  { %v4067_v42 = vld [vmem:[%s4945_s7 + $0x44] sm:$0xf] }
  0xf6   :  { %v929_v40 = vadd.f32 %v928_v49, %v915_v51  ;;  %1285 = vmatpush.bf16.msra.mxu1 %v3301_v45  ;;  %v3289_v49 = vor.u32 %v4038_v47, %v3288_v46  ;;  %v3409_v45 = vor.u32 %v4068_v41, %v3408_v39  ;;  %v3804_v39 = vld [vmem:[#allocation4 + $0x2d8] sm:$0xf]  ;;  %v4169_v41 = vld [vmem:[#allocation4 + $0x2f0] sm:$0xf0] }
  0xf7   :  { %v954_v50 = vpop.f32.mrf.mxu3 }
  0xf8   :  { %v955_v55 = vadd.f32 %v954_v50, %v941_v36  ;;  %v3290_v50 = vld [vmem:[%s4943_s5 + $0x18] sm:$0xf0]  ;;  %1272 = vmatpush.bf16.msra.mxu0 %v3289_v49  ;;  %v3280_v36 = vld [vmem:[%s4943_s5] sm:$0xf]  ;;  %1501 = vmatpush.bf16.msra.mxu3 %v3409_v45  ;;  %v4120_v45 = vld [vmem:[#allocation4 + $0x168] sm:$0xf0] }
  0xf9   :  { %v3293_v51 = vor.u32 %v4037_v48, %v3290_v50  ;;  %v3413_v48 = vor.u32 %v4067_v42, %v3410_v43  ;;  %v4166_v42 = vld [vmem:[#allocation4 + $0x2dc] sm:$0xf]  ;;  %v3806_v43 = vld [vmem:[#allocation4 + $0x2f4] sm:$0xf0] }
  0xfb   :  { %v942_v52 = vpop.f32.mrf.mxu2  ;;  %1286 = vmatpush.bf16.msra.mxu1 %v3293_v51 }
  0xfc   :  { %v943_v57 = vadd.f32 %v942_v52, %v929_v40  ;;  %v4036_v40 = vld [vmem:[%s4943_s5 + $0x4] sm:$0xf0]  ;;  %v4035_v52 = vld [vmem:[%s4943_s5 + $0x4] sm:$0xf] }
  0xff   :  { %v956_v59 = vpop.f32.mrf.mxu3 }
 0x100   :  { %v957_v60 = vadd.f32 %v956_v59, %v943_v57  ;;  %v4058_v57 = vld [vmem:[%s4944_s6 + $0x38] sm:$0xff] }
 0x101   :  { %1379 = vmatpush.bf16.msra.mxu2 %v4058_v57 }
 0x10b   :  { %v968_v54 = vpop.f32.mrf.mxu0 }
 0x10c   :  { %v982_v56 = vpop.f32.mrf.mxu1  ;;  %v969_v58 = vadd.f32 %v968_v54, %v955_v55  ;;  %v3281_v54 = vor.u32 %v4036_v40, %v3280_v36  ;;  %v3282_v55 = vld [vmem:[%s4943_s5 + $0x8] sm:$0xf0] }
 0x10e   :  { %v983_v62 = vadd.f32 %v982_v56, %v969_v58  ;;  %v3285_v56 = vor.u32 %v4035_v52, %v3282_v55  ;;  %1273 = vmatpush.bf16.msra.mxu0 %v3281_v54  ;;  %v1298_v52 = vld [vmem:[%s4940_s2] sm:$0xff]  ;;  %v1299_v54 = vld [vmem:[%s4940_s2 + $0x8] sm:$0xff] }
 0x110   :  { %v988_v2 = vmax.f32 %v983_v62, 0.0  ;;  %1287 = vmatpush.bf16.msra.mxu1 %v3285_v56 }
 0x112   :  { %v996_v7 = vmul.f32 %v992_v4, %v988_v2  ;;  %1512 = vmatpush.bf16.msrb.mxu0 %v3437_v8  ;;  %v4180_v8 = vld [vmem:[#allocation4 + $0x34c] sm:$0xf] }
 0x113   :  { %v970_v63 = vpop.f32.mrf.mxu0 }
 0x114   :  { %v971_v0 = vadd.f32 %v970_v63, %v957_v60  ;;  %v984_v1 = vpop.f32.mrf.mxu1  ;;  %v4193_v60 = vld [vmem:[%s4947_s9 + $0x2] ss:$0 sm:$0xff] }
 0x116   :  { %v985_v3 = vadd.f32 %v984_v1, %v971_v0  ;;  %1513 = vmatpush.bf16.msrb.mxu0 %v3429_v20  ;;  %v4173_v20 = vld [vmem:[#allocation4 + $0x314] sm:$0xf] }
 0x118   :  { %v990_v6 = vmax.f32 %v985_v3, 0.0 }
 0x11a   :  { %v998_v9 = vmul.f32 %v994_v5, %v990_v6  ;;  %1514 = vmatpush.bf16.msrb.mxu0 %v3421_v38  ;;  %v3641_v38 = vor.u32 %v4124_v35, %v3638_v33  ;;  %v3468_v33 = vld [vmem:[#allocation4 + $0x38] sm:$0xf] }
 0x11c   :  { %v1000_v10 = vpack.c.bf16 %v998_v9, %v996_v7  ;;  %v4057_v7 = vld [vmem:[%s4944_s6 + $0x30] sm:$0xff]  ;;  %v4056_v9 = vld [vmem:[%s4944_s6 + $0x28] sm:$0xff] }
 0x11d   :  { %1380 = vmatpush.bf16.msra.mxu2 %v4057_v7 }
 0x11e   :  { %1155 = vmatmul.bf16.vlgmr.msrb.gmra.mxu3 %v1000_v10  ;;  %v4055_v10 = vld [vmem:[%s4944_s6 + $0x20] sm:$0xff]  ;;  %1515 = vmatpush.bf16.msrb.mxu0 %v3413_v48  ;;  %v3610_v48 = vld [vmem:[#allocation4 + $0x16c] sm:$0xf0] }
 0x121   :  { %1381 = vmatpush.bf16.msra.mxu2 %v4056_v9  ;;  %v3394_v9 = vld [vmem:[%s4945_s7 + $0x28] sm:$0xf0] }
 0x125   :  { %1382 = vmatpush.bf16.msra.mxu2 %v4055_v10 }
 0x129   :  { %1383 = vmatpush.bf16.msra.mxu2 %v4054_v11  ;;  %v3384_v11 = vld [vmem:[%s4945_s7 + $0x10] sm:$0xf] }
 0x12d   :  { %1384 = vmatpush.bf16.msra.mxu2 %v4053_v12  ;;  %v4062_v12 = vld [vmem:[%s4945_s7 + $0x14] sm:$0xf0] }
 0x131   :  { %1385 = vmatpush.bf16.msra.mxu2 %v4052_v13  ;;  %v4061_v13 = vld [vmem:[%s4945_s7 + $0x14] sm:$0xf] }
 0x135   :  { %1386 = vmatpush.bf16.msra.mxu2 %v4051_v14  ;;  %v3385_v14 = vor.u32 %v4062_v12, %v3384_v11  ;;  %v3524_v11 = vld [vmem:[#allocation4 + $0xa8] sm:$0xf] }
 0x139   :  { %2266 = vmatpush.bf16.msrb.mxu2 %v3861_v25  ;;  %v4092_v25 = vld [vmem:[#allocation4 + $0x88] sm:$0xf0] }
 0x167   :  { %v1142_v58 = vpop.f32.mrf.mxu2 }
 0x168   :  { %v1143_v63 = vadd.f32 %v4193_v60, %v1142_v58 }
 0x16f   :  { %v1144_v62 = vpop.f32.mrf.mxu2 }
 0x170   :  { %v1145_v0 = vadd.f32 %v4193_v60, %v1144_v62  ;;  %v3400_v62 = vld [vmem:[%s4945_s7 + $0x30] sm:$0xf] }
 0x1a1   :  { %v1156_v59 = vpop.f32.mrf.mxu3 }
 0x1a2   :  { %v1157_v1 = vadd.f32 %v1156_v59, %v1143_v63  ;;  %v4066_v63 = vld [vmem:[%s4945_s7 + $0x34] sm:$0xf0] }
 0x1a4   :  { %v1161_v4 = vmax.f32 %v1157_v1, 0.0  ;;  %v3401_v1 = vor.u32 %v4066_v63, %v3400_v62  ;;  %v3552_v62 = vld [vmem:[#allocation4 + $0xe0] sm:$0xf] }
 0x1a6   :  { %1502 = vmatpush.bf16.msra.mxu3 %v3401_v1  ;;  %v4103_v1 = vld [vmem:[#allocation4 + $0xe4] sm:$0xf] }
 0x1a9   :  { %v1158_v2 = vpop.f32.mrf.mxu3 }
 0x1aa   :  { %v1159_v3 = vadd.f32 %v1158_v2, %v1145_v0  ;;  %v4065_v0 = vld [vmem:[%s4945_s7 + $0x34] sm:$0xf]  ;;  %v3402_v2 = vld [vmem:[%s4945_s7 + $0x38] sm:$0xf0] }
 0x1ac   :  { %v1162_v5 = vmax.f32 %v1159_v3, 0.0  ;;  %v3405_v3 = vor.u32 %v4065_v0, %v3402_v2  ;;  %v4106_v0 = vld [vmem:[#allocation4 + $0xf8] sm:$0xf0]  ;;  %v3554_v2 = vld [vmem:[#allocation4 + $0xfc] sm:$0xf0] }
 0x1ae   :  { %v1163_v6 = vpack.c.bf16 %v1162_v5, %v1161_v4  ;;  %1516 = vmatpush.bf16.msrb.mxu0 %v3405_v3  ;;  %v3392_v4 = vld [vmem:[%s4945_s7 + $0x20] sm:$0xf]  ;;  %v4064_v5 = vld [vmem:[%s4945_s7 + $0x24] sm:$0xf0] }
 0x1af   :  { %v3393_v7 = vor.u32 %v4064_v5, %v3392_v4  ;;  %v3748_v4 = vld [vmem:[#allocation4 + $0x268] sm:$0xf]  ;;  %v4155_v5 = vld [vmem:[#allocation4 + $0x280] sm:$0xf0] }
 0x1b0   :  { %1274 = vmatmul.bf16.vlgmr.msra.gmra.mxu0 %v1163_v6  ;;  %1288 = vmatmul.bf16.vlgmr.msra.gmra.mxu1 %v1163_v6  ;;  %v4063_v6 = vld [vmem:[%s4945_s7 + $0x24] sm:$0xf]  ;;  %v3749_v12 = vor.u32 %v4155_v5, %v3748_v4 }
 0x1b1   :  { %v3397_v10 = vor.u32 %v4063_v6, %v3394_v9  ;;  %1503 = vmatpush.bf16.msra.mxu3 %v3393_v7  ;;  %v4152_v6 = vld [vmem:[#allocation4 + $0x26c] sm:$0xf]  ;;  %v3750_v7 = vld [vmem:[#allocation4 + $0x284] sm:$0xf0]  ;;  %v3553_v9 = vor.u32 %v4106_v0, %v3552_v62  ;;  %v3644_v62 = vld [vmem:[#allocation4 + $0x190] sm:$0xf] }
 0x1b3   :  { %1517 = vmatpush.bf16.msrb.mxu0 %v3397_v10  ;;  %v3557_v10 = vor.u32 %v4103_v1, %v3554_v2  ;;  %v4125_v2 = vld [vmem:[#allocation4 + $0x194] sm:$0xf] }
 0x1b5   :  { %1504 = vmatpush.bf16.msra.mxu3 %v3385_v14  ;;  %v4096_v14 = vld [vmem:[#allocation4 + $0xac] sm:$0xf] }
 0x22d   :  { %v1275_v61 = vpop.f32.mrf.mxu0  ;;  %v1289_v28 = vpop.f32.mrf.mxu1 }
 0x22e   :  { %v1276_v31 = vadd.f32 %v1275_v61, %v1182_v16  ;;  %v1290_v32 = vadd.f32 %v1289_v28, %v1183_v17  ;;  %v4176_v61 = vld [vmem:[#allocation4 + $0x328] sm:$0xf0]  ;;  %v3865_v28 = vor.u32 %v4180_v8, %v3862_v26  ;;  %v4089_v26 = vld [vmem:[#allocation4 + $0x74] sm:$0xf] }
 0x230   :  { %1294 = vst [vmem:[%s4948_s10] sm:$0xff] %v1276_v31  ;;  %v1300_v34 = vmul.f32 0.5, %v1290_v32 }
 0x231   :  { %1295 = vst [vmem:[%s4948_s10 + $0x8] sm:$0xff] %v1290_v32  ;;  %v4127_v32 = vld [vmem:[#allocation4 + $0x1a0] sm:$0xf0] }
 0x232   :  { %v1302_v44 = vmul.f32 1.442695, %v1300_v34  ;;  %v3837_v34 = vor.u32 %v4173_v20, %v3834_v29  ;;  %v3637_v37 = vor.u32 %v4127_v32, %v3636_v30  ;;  %v3692_v20 = vld [vmem:[#allocation4 + $0x1f8] sm:$0xf]  ;;  %v4141_v29 = vld [vmem:[#allocation4 + $0x210] sm:$0xf0]  ;;  %v3497_v32 = vor.u32 %v4092_v25, %v3496_v24 }
 0x233   :  { %v4138_v30 = vld [vmem:[#allocation4 + $0x1fc] sm:$0xf]  ;;  %v3814_v24 = vld [vmem:[#allocation4 + $0x2fc] sm:$0xf0] }
 0x234   :  { %4195 = vpow2.f32 %v1302_v44  ;;  %v3608_v44 = vld [vmem:[#allocation4 + $0x150] sm:$0xf]  ;;  %2252 = vmatpush.bf16.msrb.mxu1 %v3637_v37  ;;  %v4085_v37 = vld [vmem:[#allocation4 + $0x50] sm:$0xf0] }
 0x235   :  { %v1277_v46 = vpop.f32.mrf.mxu0  ;;  %v1291_v47 = vpop.f32.mrf.mxu1 }
 0x236   :  { %v1278_v49 = vadd.f32 %v1277_v46, %v1182_v16  ;;  %v1292_v50 = vadd.f32 %v1291_v47, %v1183_v17  ;;  %v3389_v16 = vor.u32 %v4061_v13, %v3386_v15  ;;  %v3376_v17 = vld [vmem:[%s4945_s7] sm:$0xf]  ;;  %v3609_v46 = vor.u32 %v4120_v45, %v3608_v44  ;;  %v4117_v47 = vld [vmem:[#allocation4 + $0x154] sm:$0xf]  ;;  %v4099_v13 = vld [vmem:[#allocation4 + $0xc0] sm:$0xf0] }
 0x237   :  { %v3377_v19 = vor.u32 %v4060_v53, %v3376_v17  ;;  %v3526_v15 = vld [vmem:[#allocation4 + $0xc4] sm:$0xf0]  ;;  %v3720_v17 = vld [vmem:[#allocation4 + $0x230] sm:$0xf]  ;;  %v4148_v53 = vld [vmem:[#allocation4 + $0x248] sm:$0xf0] }
 0x238   :  { %1296 = vst [vmem:[%s4948_s10 + $0x10] sm:$0xff] %v1278_v49  ;;  %v1301_v51 = vmul.f32 0.5, %v1292_v50  ;;  %1518 = vmatpush.bf16.msrb.mxu0 %v3389_v16  ;;  %2253 = vmatpush.bf16.msrb.mxu1 %v3609_v46  ;;  %v3753_v16 = vor.u32 %v4152_v6, %v3750_v7  ;;  %v3529_v23 = vor.u32 %v4096_v14, %v3526_v15  ;;  %v4134_v44 = vld [vmem:[#allocation4 + $0x1d8] sm:$0xf0]  ;;  %v4131_v45 = vld [vmem:[#allocation4 + $0x1c4] sm:$0xf] }
 0x239   :  { %1297 = vst [vmem:[%s4948_s10 + $0x18] sm:$0xff] %v1292_v50  ;;  %1505 = vmatpush.bf16.msra.mxu3 %v3377_v19  ;;  %v3613_v50 = vor.u32 %v4117_v47, %v3610_v48  ;;  %v4145_v19 = vld [vmem:[#allocation4 + $0x234] sm:$0xf]  ;;  %v3721_v8 = vor.u32 %v4148_v53, %v3720_v17  ;;  %v3666_v47 = vld [vmem:[#allocation4 + $0x1dc] sm:$0xf0] }
 0x23a   :  { %v1304_v36 = vmul.f32 1.442695, %v1301_v51  ;;  %v4196_v40 = vpop.eup %4195  ;;  %v3776_v51 = vld [vmem:[#allocation4 + $0x2a0] sm:$0xf]  ;;  %v3868_v48 = vld [vmem:[#allocation4 + $0x350] sm:$0xf]  ;;  %v3669_v0 = vor.u32 %v4131_v45, %v3666_v47 }
 0x23b   :  { %v1306_v55 = vmul.f32 %v4196_v40, %v1298_v52  ;;  %v3809_v40 = vor.u32 %v4166_v42, %v3806_v43  ;;  %v3580_v52 = vld [vmem:[#allocation4 + $0x118] sm:$0xf]  ;;  %v3664_v43 = vld [vmem:[#allocation4 + $0x1c0] sm:$0xf]  ;;  %v4177_v7 = vld [vmem:[#allocation4 + $0x330] sm:$0xf0] }
 0x23c   :  { %4197 = vpow2.f32 %v1304_v36  ;;  %1519 = vmatpush.bf16.msrb.mxu0 %v3381_v22  ;;  %v4162_v36 = vld [vmem:[#allocation4 + $0x2b8] sm:$0xf0]  ;;  %v3525_v22 = vor.u32 %v4099_v13, %v3524_v11  ;;  %v3840_v6 = vld [vmem:[#allocation4 + $0x318] sm:$0xf]  ;;  %v4107_v47 = vld [vmem:[#allocation4 + $0x100] sm:$0xf0] }
 0x23d   :  { %v1308_v58 = vadd.f32 %v1306_v55, %v1276_v31  ;;  %v3833_v31 = vor.u32 %v4176_v61, %v3832_v27  ;;  %2280 = vmatpush.bf16.msrb.mxu3 %v3641_v38  ;;  %v4110_v55 = vld [vmem:[#allocation4 + $0x11c] sm:$0xf]  ;;  %v3777_v63 = vor.u32 %v4162_v36, %v3776_v51  ;;  %v3498_v27 = vld [vmem:[#allocation4 + $0x8c] sm:$0xf0]  ;;  %v4194_v61 = vld [vmem:[%s4947_s9 + $0x5] ss:$0 sm:$0xff]  ;;  %v3469_v51 = vor.u32 %v4085_v37, %v3468_v33 }
 0x23e   :  { %v3501_v35 = vor.u32 %v4089_v26, %v3498_v27  ;;  %v4082_v38 = vld [vmem:[#allocation4 + $0x3c] sm:$0xf]  ;;  %v4181_v36 = vld [vmem:[#allocation4 + $0x354] sm:$0xf]  ;;  %v3842_v11 = vld [vmem:[#allocation4 + $0x334] sm:$0xf0]  ;;  %v3841_v17 = vor.u32 %v4177_v7, %v3840_v6 }
 0x23f   :  { %2267 = vmatpush.bf16.msrb.mxu2 %v3833_v31  ;;  %v3694_v31 = vld [vmem:[#allocation4 + $0x214] sm:$0xf0]  ;;  %v4118_v53 = vld [vmem:[#allocation4 + $0x15c] sm:$0xf]  ;;  %v3590_v37 = vld [vmem:[#allocation4 + $0x13c] sm:$0xf0] }
 0x240   :  { %2294 = vmatpush.bf16.msra.mxu0 %v3865_v28  ;;  %v3725_v28 = vor.u32 %v4145_v19, %v3722_v21  ;;  %v3697_v42 = vor.u32 %v4138_v30, %v3694_v31  ;;  %v3616_v15 = vld [vmem:[#allocation4 + $0x158] sm:$0xf]  ;;  %v3812_v21 = vld [vmem:[#allocation4 + $0x2e0] sm:$0xf]  ;;  %v4093_v7 = vld [vmem:[#allocation4 + $0x90] sm:$0xf0] }
 0x241   :  { %2281 = vmatpush.bf16.msrb.mxu3 %v3613_v50  ;;  %v3504_v6 = vld [vmem:[#allocation4 + $0x78] sm:$0xf] }
 0x242   :  { %v4198_v56 = vpop.eup %4197 }
 0x243   :  { %v1307_v57 = vmul.f32 %v4198_v56, %v1299_v54  ;;  %v4113_v54 = vld [vmem:[#allocation4 + $0x130] sm:$0xf0]  ;;  %v4159_v56 = vld [vmem:[#allocation4 + $0x2a4] sm:$0xf] }
 0x244   :  { %2295 = vmatpush.bf16.msra.mxu0 %v3837_v34  ;;  %v3693_v34 = vor.u32 %v4141_v29, %v3692_v20  ;;  %v4160_v20 = vld [vmem:[#allocation4 + $0x2ac] sm:$0xf]  ;;  %v3786_v29 = vld [vmem:[#allocation4 + $0x2c4] sm:$0xf0] }
 0x245   :  { %v1309_v59 = vadd.f32 %v1307_v57, %v1278_v49  ;;  %v3805_v49 = vor.u32 %v4169_v41, %v3804_v39  ;;  %v3778_v57 = vld [vmem:[#allocation4 + $0x2bc] sm:$0xf0]  ;;  %v3470_v39 = vld [vmem:[#allocation4 + $0x54] sm:$0xf0]  ;;  %v3789_v31 = vor.u32 %v4160_v20, %v3786_v29  ;;  %v1412_v20 = vld [vmem:[%s4947_s9 + $0x6] sm:$0x3] }
 0x246   :  { %v3781_v3 = vor.u32 %v4159_v56, %v3778_v57  ;;  %v4078_v56 = vld [vmem:[#allocation4 + $0x18] sm:$0xf0]  ;;  %v4075_v57 = vld [vmem:[#allocation4 + $0x4] sm:$0xf] }
 0x247   :  { %v1310_v60 = vpack.c.bf16 %v1309_v59, %v1308_v58  ;;  %v3582_v58 = vld [vmem:[#allocation4 + $0x134] sm:$0xf0]  ;;  %v3581_v59 = vor.u32 %v4113_v54, %v3580_v52  ;;  %2268 = vmatpush.bf16.msrb.mxu2 %v3805_v49  ;;  %v4184_v49 = vld [vmem:[#allocation4 + $0x368] sm:$0xf0]  ;;  %v3473_v52 = vor.u32 %v4082_v38, %v3470_v39  ;;  %v3440_v54 = vld [vmem:[#allocation4] sm:$0xf] }
 0x248   :  { %2296 = vmatpush.bf16.msra.mxu0 %v3809_v40  ;;  %v3870_v40 = vld [vmem:[#allocation4 + $0x36c] sm:$0xf0]  ;;  %v3869_v1 = vor.u32 %v4184_v49, %v3868_v48  ;;  %v4104_v49 = vld [vmem:[#allocation4 + $0xec] sm:$0xf] }
 0x249   :  { %1387 = vmatmul.bf16.vlgmr.msra.gmra.mxu2 %v1310_v60  ;;  %v3585_v60 = vor.u32 %v4110_v55, %v3582_v58  ;;  %2254 = vmatpush.bf16.msrb.mxu1 %v3581_v59  ;;  %v3665_v55 = vor.u32 %v4134_v44, %v3664_v43  ;;  %v3442_v58 = vld [vmem:[#allocation4 + $0x1c] sm:$0xf0]  ;;  %v3873_v5 = vor.u32 %v4181_v36, %v3870_v40  ;;  %v3756_v39 = vld [vmem:[#allocation4 + $0x270] sm:$0xf]  ;;  %v4153_v43 = vld [vmem:[#allocation4 + $0x274] sm:$0xf] }
 0x24a   :  { %v3758_v44 = vld [vmem:[#allocation4 + $0x28c] sm:$0xf0]  ;;  %v3728_v36 = vld [vmem:[#allocation4 + $0x238] sm:$0xf]  ;;  %v4149_v40 = vld [vmem:[#allocation4 + $0x250] sm:$0xf0] }
 0x24b   :  { %2282 = vmatpush.bf16.msrb.mxu3 %v3585_v60  ;;  %2269 = vmatpush.bf16.msrb.mxu2 %v3777_v63  ;;  %v4128_v63 = vld [vmem:[#allocation4 + $0x1a8] sm:$0xf0]  ;;  %v3761_v45 = vor.u32 %v4153_v43, %v3758_v44 }
 0x24c   :  { %2297 = vmatpush.bf16.msra.mxu0 %v3781_v3  ;;  %v3646_v3 = vld [vmem:[#allocation4 + $0x1ac] sm:$0xf0]  ;;  %v3645_v13 = vor.u32 %v4128_v63, %v3644_v62 }
 0x24d   :  { %2255 = vmatpush.bf16.msrb.mxu1 %v3553_v9  ;;  %v3441_v9 = vor.u32 %v4078_v56, %v3440_v54  ;;  %v3649_v14 = vor.u32 %v4125_v2, %v3646_v3  ;;  %v4146_v54 = vld [vmem:[#allocation4 + $0x23c] sm:$0xf]  ;;  %v3534_v62 = vld [vmem:[#allocation4 + $0xcc] sm:$0xf0]  ;;  %v4139_v3 = vld [vmem:[#allocation4 + $0x204] sm:$0xf] }
 0x24f   :  { %2283 = vmatpush.bf16.msrb.mxu3 %v3557_v10  ;;  %2270 = vmatpush.bf16.msrb.mxu2 %v3749_v12  ;;  %v4174_v10 = vld [vmem:[#allocation4 + $0x31c] sm:$0xf]  ;;  %v3445_v12 = vor.u32 %v4075_v57, %v3442_v58  ;;  %v3532_v57 = vld [vmem:[#allocation4 + $0xb0] sm:$0xf]  ;;  %v4100_v58 = vld [vmem:[#allocation4 + $0xc8] sm:$0xf0] }
 0x250   :  { %2298 = vmatpush.bf16.msra.mxu0 %v3753_v16  ;;  %v4121_v16 = vld [vmem:[#allocation4 + $0x170] sm:$0xf0]  ;;  %v3845_v19 = vor.u32 %v4174_v10, %v3842_v11  ;;  %v4090_v10 = vld [vmem:[#allocation4 + $0x7c] sm:$0xf]  ;;  %v3506_v11 = vld [vmem:[#allocation4 + $0x94] sm:$0xf0] }
 0x251   :  { %2256 = vmatpush.bf16.msrb.mxu1 %v3525_v22  ;;  %v4170_v22 = vld [vmem:[#allocation4 + $0x2f8] sm:$0xf0] }
 0x252   :  { %v3813_v26 = vor.u32 %v4170_v22, %v3812_v21  ;;  %v4083_v22 = vld [vmem:[#allocation4 + $0x44] sm:$0xf] }
 0x253   :  { %2284 = vmatpush.bf16.msrb.mxu3 %v3529_v23  ;;  %2271 = vmatpush.bf16.msrb.mxu2 %v3721_v8  ;;  %v4167_v23 = vld [vmem:[#allocation4 + $0x2e4] sm:$0xf]  ;;  %v3617_v8 = vor.u32 %v4121_v16, %v3616_v15  ;;  %v4132_v16 = vld [vmem:[#allocation4 + $0x1cc] sm:$0xf] }
 0x254   :  { %2299 = vmatpush.bf16.msra.mxu0 %v3725_v28  ;;  %v3817_v27 = vor.u32 %v4167_v23, %v3814_v24  ;;  %v4163_v28 = vld [vmem:[#allocation4 + $0x2c0] sm:$0xf0]  ;;  %v3478_v23 = vld [vmem:[#allocation4 + $0x5c] sm:$0xf0] }
 0x255   :  { %2257 = vmatpush.bf16.msrb.mxu1 %v3497_v32  ;;  %v3588_v32 = vld [vmem:[#allocation4 + $0x120] sm:$0xf]  ;;  %v3481_v24 = vor.u32 %v4083_v22, %v3478_v23 }
 0x257   :  { %2285 = vmatpush.bf16.msrb.mxu3 %v3501_v35  ;;  %2272 = vmatpush.bf16.msrb.mxu2 %v3693_v34  ;;  %v4114_v35 = vld [vmem:[#allocation4 + $0x138] sm:$0xf0]  ;;  %v4111_v34 = vld [vmem:[#allocation4 + $0x124] sm:$0xf] }
 0x258   :  { %2300 = vmatpush.bf16.msra.mxu0 %v3697_v42  ;;  %v3589_v33 = vor.u32 %v4114_v35, %v3588_v32  ;;  %v3593_v38 = vor.u32 %v4111_v34, %v3590_v37  ;;  %v1414_v35 = vperm.slane %v1412_v20, 0  ;;  %v3876_v34 = vld [vmem:[#allocation4 + $0x358] sm:$0xf] }
 0x259   :  { %2258 = vmatpush.bf16.msrb.mxu1 %v3469_v51 }
 0x25b   :  { %2286 = vmatpush.bf16.msrb.mxu3 %v3473_v52  ;;  %2273 = vmatpush.bf16.msrb.mxu2 %v3665_v55  ;;  %v3729_v52 = vor.u32 %v4149_v40, %v3728_v36  ;;  %v3730_v55 = vld [vmem:[#allocation4 + $0x254] sm:$0xf0] }
 0x25c   :  { %2301 = vmatpush.bf16.msra.mxu0 %v3669_v0  ;;  %v3733_v56 = vor.u32 %v4146_v54, %v3730_v55  ;;  %v3700_v0 = vld [vmem:[#allocation4 + $0x200] sm:$0xf]  ;;  %v3652_v40 = vld [vmem:[#allocation4 + $0x198] sm:$0xf]  ;;  %v4129_v54 = vld [vmem:[#allocation4 + $0x1b0] sm:$0xf0] }
 0x25d   :  { %2259 = vmatpush.bf16.msrb.mxu1 %v3441_v9  ;;  %v3505_v9 = vor.u32 %v4093_v7, %v3504_v6  ;;  %v4126_v55 = vld [vmem:[#allocation4 + $0x19c] sm:$0xf]  ;;  %v4119_v7 = vld [vmem:[#allocation4 + $0x164] sm:$0xf] }
 0x25e   :  { %v4122_v6 = vld [vmem:[#allocation4 + $0x178] sm:$0xf0] }
 0x25f   :  { %2322 = vmatpush.bf16.msra.mxu2 %v3869_v1  ;;  %2287 = vmatpush.bf16.msrb.mxu3 %v3445_v12  ;;  %v4142_v1 = vld [vmem:[#allocation4 + $0x218] sm:$0xf0]  ;;  %v3509_v12 = vor.u32 %v4090_v10, %v3506_v11 }
 0x260   :  { %v3701_v2 = vor.u32 %v4142_v1, %v3700_v0  ;;  %v4168_v0 = vld [vmem:[#allocation4 + $0x2ec] sm:$0xf]  ;;  %v3822_v1 = vld [vmem:[#allocation4 + $0x304] sm:$0xf0] }
 0x261   :  { %2308 = vmatpush.bf16.msra.mxu1 %v3645_v13  ;;  %v3672_v13 = vld [vmem:[#allocation4 + $0x1c8] sm:$0xf]  ;;  %v3825_v11 = vor.u32 %v4168_v0, %v3822_v1 }
 0x263   :  { %2323 = vmatpush.bf16.msra.mxu2 %v3841_v17  ;;  %v3674_v17 = vld [vmem:[#allocation4 + $0x1e4] sm:$0xf0] }
 0x265   :  { %2309 = vmatpush.bf16.msra.mxu1 %v3617_v8  ;;  %v3448_v8 = vld [vmem:[#allocation4 + $0x8] sm:$0xf] }
 0x267   :  { %2324 = vmatpush.bf16.msra.mxu2 %v3813_v26 }
 0x269   :  { %2310 = vmatpush.bf16.msra.mxu1 %v3589_v33 }
 0x2cc   :  { %v1388_v18 = vpop.f32.mrf.mxu2 }
 0x2cd   :  { %v1389_v41 = vadd.f32 %v4194_v61, %v1388_v18  ;;  %v3618_v18 = vld [vmem:[#allocation4 + $0x174] sm:$0xf0] }
 0x2ce   :  { %v3621_v25 = vor.u32 %v4118_v53, %v3618_v18  ;;  %v3677_v53 = vor.u32 %v4132_v16, %v3674_v17  ;;  %v3476_v18 = vld [vmem:[#allocation4 + $0x40] sm:$0xf] }
 0x2cf   :  { %v1393_v59 = vmax.f32 %v1389_v41, 0.0  ;;  %v4156_v41 = vld [vmem:[#allocation4 + $0x288] sm:$0xf0] }
 0x2d0   :  { %v3757_v42 = vor.u32 %v4156_v41, %v3756_v39  ;;  %v4182_v39 = vld [vmem:[#allocation4 + $0x35c] sm:$0xf]  ;;  %v3878_v41 = vld [vmem:[#allocation4 + $0x374] sm:$0xf0] }
 0x2d4   :  { %v1390_v46 = vpop.f32.mrf.mxu2 }
 0x2d5   :  { %v1391_v50 = vadd.f32 %v4194_v61, %v1390_v46  ;;  %v3784_v61 = vld [vmem:[#allocation4 + $0x2a8] sm:$0xf] }
 0x2d6   :  { %v3785_v30 = vor.u32 %v4163_v28, %v3784_v61  ;;  %v3560_v46 = vld [vmem:[#allocation4 + $0xe8] sm:$0xf] }
 0x2d7   :  { %v1394_v60 = vmax.f32 %v1391_v50, 0.0  ;;  %v3561_v48 = vor.u32 %v4107_v47, %v3560_v46  ;;  %v3562_v50 = vld [vmem:[#allocation4 + $0x104] sm:$0xf0]  ;;  %v3848_v46 = vld [vmem:[#allocation4 + $0x320] sm:$0xf] }
 0x2d8   :  { %2325 = vmatpush.bf16.msra.mxu2 %v3785_v30  ;;  %v3565_v51 = vor.u32 %v4104_v49, %v3562_v50  ;;  %v3450_v61 = vld [vmem:[#allocation4 + $0x24] sm:$0xf0]  ;;  %v1415_v30 = vperm.slane %v1412_v20, 1  ;;  %v4178_v49 = vld [vmem:[#allocation4 + $0x338] sm:$0xf0] }
 0x2d9   :  { %v1395_v4 = vpack.c.bf16 %v1394_v60, %v1393_v59  ;;  %2311 = vmatpush.bf16.msra.mxu1 %v3561_v48  ;;  %v3533_v59 = vor.u32 %v4100_v58, %v3532_v57  ;;  %v4097_v60 = vld [vmem:[#allocation4 + $0xb4] sm:$0xf]  ;;  %v4175_v50 = vld [vmem:[#allocation4 + $0x324] sm:$0xf]  ;;  %v3849_v57 = vor.u32 %v4178_v49, %v3848_v46  ;;  %v4108_v20 = vld [vmem:[#allocation4 + $0x108] sm:$0xf0] }
 0x2da   :  { %v3537_v63 = vor.u32 %v4097_v60, %v3534_v62  ;;  %v4171_v60 = vld [vmem:[#allocation4 + $0x300] sm:$0xf0] }
 0x2db   :  { %1506 = vmatmul.bf16.vlgmr.msra.gmra.mxu3 %v1395_v4  ;;  %1520 = vmatmul.bf16.vlgmr.msrb.gmra.mxu0 %v1395_v4  ;;  %v3702_v4 = vld [vmem:[#allocation4 + $0x21c] sm:$0xf0]  ;;  %v4143_v49 = vld [vmem:[#allocation4 + $0x220] sm:$0xf0] }
 0x2dc   :  { %2350 = vmatpush.bf16.msrb.mxu0 %v3873_v5  ;;  %2336 = vmatpush.bf16.msra.mxu3 %v3649_v14  ;;  %v3705_v5 = vor.u32 %v4139_v3, %v3702_v4  ;;  %v4135_v14 = vld [vmem:[#allocation4 + $0x1e0] sm:$0xf0]  ;;  %v3624_v4 = vld [vmem:[#allocation4 + $0x160] sm:$0xf] }
 0x2dd   :  { %2326 = vmatpush.bf16.msra.mxu2 %v3757_v42  ;;  %2312 = vmatpush.bf16.msra.mxu1 %v3533_v59  ;;  %v3673_v15 = vor.u32 %v4135_v14, %v3672_v13  ;;  %v3820_v59 = vld [vmem:[#allocation4 + $0x2e8] sm:$0xf]  ;;  %v4164_v13 = vld [vmem:[#allocation4 + $0x2c8] sm:$0xf0]  ;;  %v4161_v14 = vld [vmem:[#allocation4 + $0x2b4] sm:$0xf]  ;;  %v3625_v16 = vor.u32 %v4122_v6, %v3624_v4 }
 0x2de   :  { %v3821_v10 = vor.u32 %v4171_v60, %v3820_v59  ;;  %v3680_v59 = vld [vmem:[#allocation4 + $0x1d0] sm:$0xf]  ;;  %v4136_v60 = vld [vmem:[#allocation4 + $0x1e8] sm:$0xf0]  ;;  %v3484_v4 = vld [vmem:[#allocation4 + $0x48] sm:$0xf] }
 0x2df   :  { %v4087_v6 = vld [vmem:[#allocation4 + $0x60] sm:$0xf0] }
 0x2e0   :  { %2351 = vmatpush.bf16.msrb.mxu0 %v3845_v19  ;;  %2337 = vmatpush.bf16.msra.mxu3 %v3621_v25  ;;  %v4086_v19 = vld [vmem:[#allocation4 + $0x58] sm:$0xf0]  ;;  %v4079_v25 = vld [vmem:[#allocation4 + $0x20] sm:$0xf0] }
 0x2e1   :  { %2327 = vmatpush.bf16.msra.mxu2 %v3729_v52  ;;  %2313 = vmatpush.bf16.msra.mxu1 %v3505_v9  ;;  %v3477_v21 = vor.u32 %v4086_v19, %v3476_v18  ;;  %v3449_v26 = vor.u32 %v4079_v25, %v3448_v8  ;;  %v3626_v9 = vld [vmem:[#allocation4 + $0x17c] sm:$0xf0]  ;;  %v4115_v18 = vld [vmem:[#allocation4 + $0x140] sm:$0xf0]  ;;  %v4112_v19 = vld [vmem:[#allocation4 + $0x12c] sm:$0xf] }
 0x2e2   :  { %v3629_v17 = vor.u32 %v4119_v7, %v3626_v9  ;;  %v4157_v8 = vld [vmem:[#allocation4 + $0x290] sm:$0xf0]  ;;  %v4154_v25 = vld [vmem:[#allocation4 + $0x27c] sm:$0xf]  ;;  %v4084_v7 = vld [vmem:[#allocation4 + $0x4c] sm:$0xf] }
 0x2e3   :  { %v3486_v9 = vld [vmem:[#allocation4 + $0x64] sm:$0xf0] }
 0x2e4   :  { %2352 = vmatpush.bf16.msrb.mxu0 %v3817_v27  ;;  %2338 = vmatpush.bf16.msra.mxu3 %v3593_v38  ;;  %v4076_v27 = vld [vmem:[#allocation4 + $0xc] sm:$0xf]  ;;  %v4185_v38 = vld [vmem:[#allocation4 + $0x370] sm:$0xf0] }
 0x2e5   :  { %2328 = vmatpush.bf16.msra.mxu2 %v3701_v2  ;;  %2314 = vmatpush.bf16.msra.mxu1 %v3477_v21  ;;  %v3453_v28 = vor.u32 %v4076_v27, %v3450_v61  ;;  %v3877_v44 = vor.u32 %v4185_v38, %v3876_v34  ;;  %v3653_v2 = vor.u32 %v4129_v54, %v3652_v40  ;;  %v3598_v21 = vld [vmem:[#allocation4 + $0x144] sm:$0xf0]  ;;  %v4147_v34 = vld [vmem:[#allocation4 + $0x244] sm:$0xf]  ;;  %v4094_v54 = vld [vmem:[#allocation4 + $0x98] sm:$0xf0] }
 0x2e6   :  { %v3601_v61 = vor.u32 %v4112_v19, %v3598_v21  ;;  %v3458_v19 = vld [vmem:[#allocation4 + $0x2c] sm:$0xf0]  ;;  %v3660_v21 = vld [vmem:[#allocation4 + $0x1a0] sm:$0xf] }
 0x2e8   :  { %2353 = vmatpush.bf16.msrb.mxu0 %v3789_v31  ;;  %2339 = vmatpush.bf16.msra.mxu3 %v3565_v51  ;;  %v3850_v51 = vld [vmem:[#allocation4 + $0x33c] sm:$0xf0] }
 0x2e9   :  { %2329 = vmatpush.bf16.msra.mxu2 %v3673_v15  ;;  %2315 = vmatpush.bf16.msra.mxu1 %v3449_v26  ;;  %v3853_v58 = vor.u32 %v4175_v50, %v3850_v51  ;;  %v3794_v15 = vld [vmem:[#allocation4 + $0x2cc] sm:$0xf0]  ;;  %v3766_v26 = vld [vmem:[#allocation4 + $0x294] sm:$0xf0]  ;;  %v4140_v50 = vld [vmem:[#allocation4 + $0x20c] sm:$0xf] }
 0x2ea   :  { %v3797_v23 = vor.u32 %v4161_v14, %v3794_v15  ;;  %v3710_v51 = vld [vmem:[#allocation4 + $0x224] sm:$0xf0]  ;;  %v3489_v14 = vor.u32 %v4084_v7, %v3486_v9 }
 0x2eb   :  { %v3856_v15 = vld [vmem:[#allocation4 + $0x328] sm:$0xf] }
 0x2ec   :  { %2354 = vmatpush.bf16.msrb.mxu0 %v3761_v45  ;;  %2340 = vmatpush.bf16.msra.mxu3 %v3537_v63  ;;  %v3881_v45 = vor.u32 %v4182_v39, %v3878_v41  ;;  %v3540_v41 = vld [vmem:[#allocation4 + $0xb8] sm:$0xf] }
 0x2f0   :  { %2355 = vmatpush.bf16.msrb.mxu0 %v3733_v56  ;;  %2341 = vmatpush.bf16.msra.mxu3 %v3509_v12  ;;  %v3654_v56 = vld [vmem:[#allocation4 + $0x1b4] sm:$0xf0]  ;;  %v3792_v12 = vld [vmem:[#allocation4 + $0x2b0] sm:$0xf] }
 0x2f1   :  { %v3657_v3 = vor.u32 %v4126_v55, %v3654_v56  ;;  %v3793_v22 = vor.u32 %v4164_v13, %v3792_v12  ;;  %v4091_v55 = vld [vmem:[#allocation4 + $0x84] sm:$0xf]  ;;  %v3514_v56 = vld [vmem:[#allocation4 + $0x9c] sm:$0xf0]  ;;  %v3485_v13 = vor.u32 %v4087_v6, %v3484_v4 }
 0x2f2   :  { %v3517_v1 = vor.u32 %v4091_v55, %v3514_v56  ;;  %v3688_v55 = vld [vmem:[#allocation4 + $0x1d8] sm:$0xf]  ;;  %v4137_v56 = vld [vmem:[#allocation4 + $0x1f0] sm:$0xf0] }
 0x2f4   :  { %2356 = vmatpush.bf16.msrb.mxu0 %v3705_v5  ;;  %2342 = vmatpush.bf16.msra.mxu3 %v3481_v24  ;;  %v3764_v24 = vld [vmem:[#allocation4 + $0x278] sm:$0xf] }
 0x2f8   :  { %2357 = vmatpush.bf16.msrb.mxu0 %v3677_v53  ;;  %2343 = vmatpush.bf16.msra.mxu3 %v3453_v28  ;;  %v3596_v53 = vld [vmem:[#allocation4 + $0x128] sm:$0xf]  ;;  %v3568_v28 = vld [vmem:[#allocation4 + $0xf0] sm:$0xf] }
 0x2f9   :  { %v3597_v27 = vor.u32 %v4115_v18, %v3596_v53  ;;  %v3569_v38 = vor.u32 %v4108_v20, %v3568_v28  ;;  %v4080_v53 = vld [vmem:[#allocation4 + $0x28] sm:$0xf0]  ;;  %v4077_v18 = vld [vmem:[#allocation4 + $0x14] sm:$0xf]  ;;  %v4123_v28 = vld [vmem:[#allocation4 + $0x180] sm:$0xf0] }
 0x358   :  { %v1521_v29 = vpop.f32.mrf.mxu0 }
 0x359   :  { %v1522_v32 = vadd.f32 %v1521_v29, %v1415_v30  ;;  %v4105_v29 = vld [vmem:[#allocation4 + $0xf4] sm:$0xf] }
 0x35b   :  { %v1527_v42 = vmax.f32 %v1522_v32, 0.0  ;;  %v3769_v32 = vor.u32 %v4154_v25, %v3766_v26  ;;  %v3828_v25 = vld [vmem:[#allocation4 + $0x2f0] sm:$0xf]  ;;  %v4172_v26 = vld [vmem:[#allocation4 + $0x308] sm:$0xf0] }
 0x35c   :  { %v3829_v20 = vor.u32 %v4172_v26, %v3828_v25 }
 0x35e   :  { %v1507_v31 = vpop.f32.mrf.mxu3 }
 0x35f   :  { %v1508_v47 = vadd.f32 %v1507_v31, %v1414_v35  ;;  %v3765_v31 = vor.u32 %v4157_v8, %v3764_v24  ;;  %v3461_v8 = vor.u32 %v4077_v18, %v3458_v19 }
 0x360   :  { %v1523_v33 = vpop.f32.mrf.mxu0 }
 0x361   :  { %v1524_v37 = vadd.f32 %v1523_v33, %v1415_v30  ;;  %v1526_v62 = vmax.f32 %v1508_v47, 0.0  ;;  %v3570_v30 = vld [vmem:[#allocation4 + $0x10c] sm:$0xf0]  ;;  %v4150_v33 = vld [vmem:[#allocation4 + $0x258] sm:$0xf0] }
 0x362   :  { %v3573_v39 = vor.u32 %v4105_v29, %v3570_v30  ;;  %v3708_v47 = vld [vmem:[#allocation4 + $0x208] sm:$0xf]  ;;  %v3800_v29 = vld [vmem:[#allocation4 + $0x2b8] sm:$0xf]  ;;  %v4165_v30 = vld [vmem:[#allocation4 + $0x2d0] sm:$0xf0] }
 0x363   :  { %v1529_v43 = vmax.f32 %v1524_v37, 0.0  ;;  %v3738_v37 = vld [vmem:[#allocation4 + $0x25c] sm:$0xf0] }
 0x364   :  { %v3741_v46 = vor.u32 %v4147_v34, %v3738_v37  ;;  %v3772_v34 = vld [vmem:[#allocation4 + $0x280] sm:$0xf]  ;;  %v4158_v37 = vld [vmem:[#allocation4 + $0x298] sm:$0xf0] }
 0x365   :  { %v4762_v48 = vpack.c.bf16 %v1529_v43, %v1527_v42  ;;  %v4101_v42 = vld [vmem:[#allocation4 + $0xd0] sm:$0xf0]  ;;  %v4098_v43 = vld [vmem:[#allocation4 + $0xbc] sm:$0xf] }
 0x366   :  { %v1509_v36 = vpop.f32.mrf.mxu3 }
 0x367   :  { %v1510_v52 = vadd.f32 %v1509_v36, %v1414_v35  ;;  %2274 = vmatmul.bf16.vlgmr.msrb.gmra.mxu2 %v4762_v48  ;;  %2302 = vmatmul.bf16.vlgmr.msra.gmra.mxu0 %v4762_v48  ;;  %v3736_v35 = vld [vmem:[#allocation4 + $0x240] sm:$0xf]  ;;  %v3541_v36 = vor.u32 %v4101_v42, %v3540_v41  ;;  %v4109_v41 = vld [vmem:[#allocation4 + $0x110] sm:$0xf0]  ;;  %v3773_v42 = vor.u32 %v4158_v37, %v3772_v34 }
 0x368   :  { %2378 = vmatpush.bf16.msrb.mxu2 %v3877_v44  ;;  %2406 = vmatpush.bf16.msra.mxu0 %v3881_v45  ;;  %v3542_v44 = vld [vmem:[#allocation4 + $0xd4] sm:$0xf0]  ;;  %v3737_v45 = vor.u32 %v4150_v33, %v3736_v35  ;;  %v4116_v35 = vld [vmem:[#allocation4 + $0x148] sm:$0xf0]  ;;  %v3801_v33 = vor.u32 %v4165_v30, %v3800_v29 }
 0x369   :  { %v1528_v63 = vmax.f32 %v1510_v52, 0.0  ;;  %v3545_v40 = vor.u32 %v4098_v43, %v3542_v44  ;;  %v3512_v52 = vld [vmem:[#allocation4 + $0x80] sm:$0xf]  ;;  %v3744_v43 = vld [vmem:[#allocation4 + $0x248] sm:$0xf] }
 0x36a   :  { %v3513_v0 = vor.u32 %v4094_v54, %v3512_v52  ;;  %v4151_v44 = vld [vmem:[#allocation4 + $0x260] sm:$0xf0] }
 0x36b   :  { %v4766_v5 = vpack.c.bf16 %v1528_v63, %v1526_v62  ;;  %v4133_v62 = vld [vmem:[#allocation4 + $0x1d4] sm:$0xf]  ;;  %v3682_v63 = vld [vmem:[#allocation4 + $0x1ec] sm:$0xf0]  ;;  %v4095_v52 = vld [vmem:[#allocation4 + $0xa0] sm:$0xf0] }
 0x36c   :  { %2379 = vmatpush.bf16.msrb.mxu2 %v3849_v57  ;;  %2407 = vmatpush.bf16.msra.mxu0 %v3853_v58  ;;  %v3709_v57 = vor.u32 %v4143_v49, %v3708_v47  ;;  %v3713_v58 = vor.u32 %v4140_v50, %v3710_v51  ;;  %v4102_v47 = vld [vmem:[#allocation4 + $0xd8] sm:$0xf0]  ;;  %v3745_v49 = vor.u32 %v4151_v44, %v3744_v43  ;;  %v3716_v50 = vld [vmem:[#allocation4 + $0x210] sm:$0xf]  ;;  %v4144_v51 = vld [vmem:[#allocation4 + $0x228] sm:$0xf0] }
 0x36d   :  { %2260 = vmatmul.bf16.vlgmr.msrb.gmra.mxu1 %v4766_v5  ;;  %2288 = vmatmul.bf16.vlgmr.msrb.gmra.mxu3 %v4766_v5  ;;  %v3717_v54 = vor.u32 %v4144_v51, %v3716_v50 }
 0x36e   :  { %2364 = vmatpush.bf16.msrb.mxu1 %v3653_v2  ;;  %2392 = vmatpush.bf16.msrb.mxu3 %v3657_v3  ;;  %v3884_v2 = vld [vmem:[#allocation4 + $0x360] sm:$0xf]  ;;  %v4186_v3 = vld [vmem:[#allocation4 + $0x378] sm:$0xf0] }
 0x36f   :  { %v3885_v12 = vor.u32 %v4186_v3, %v3884_v2  ;;  %v4783_v2 = vld [vmem:[%s4947_s9 + $0x8] sm:$0xff] }
 0x370   :  { %2380 = vmatpush.bf16.msrb.mxu2 %v3821_v10  ;;  %2408 = vmatpush.bf16.msra.mxu0 %v3825_v11  ;;  %v3681_v10 = vor.u32 %v4136_v60, %v3680_v59  ;;  %v3685_v11 = vor.u32 %v4133_v62, %v3682_v63  ;;  %v4088_v59 = vld [vmem:[#allocation4 + $0x68] sm:$0xf0]  ;;  %v3689_v60 = vor.u32 %v4137_v56, %v3688_v55  ;;  %v3464_v63 = vld [vmem:[#allocation4 + $0x18] sm:$0xf]  ;;  %v1662_v3 = vperm.slane %v4783_v2, 0 }
 0x371   :  { %v1667_v55 = vperm.slane %v4783_v2, 5 }
 0x372   :  { %2365 = vmatpush.bf16.msrb.mxu1 %v3625_v16  ;;  %2393 = vmatpush.bf16.msrb.mxu3 %v3629_v17  ;;  %v4179_v16 = vld [vmem:[#allocation4 + $0x340] sm:$0xf0]  ;;  %v3456_v17 = vld [vmem:[#allocation4 + $0x10] sm:$0xf] }
 0x373   :  { %v3457_v24 = vor.u32 %v4080_v53, %v3456_v17 }
 0x374   :  { %2381 = vmatpush.bf16.msrb.mxu2 %v3793_v22  ;;  %2409 = vmatpush.bf16.msra.mxu0 %v3797_v23  ;;  %v4130_v22 = vld [vmem:[#allocation4 + $0x1b8] sm:$0xf0]  ;;  %v3857_v23 = vor.u32 %v4179_v16, %v3856_v15 }
 0x376   :  { %2366 = vmatpush.bf16.msrb.mxu1 %v3597_v27  ;;  %2394 = vmatpush.bf16.msrb.mxu3 %v3601_v61  ;;  %v3661_v27 = vor.u32 %v4130_v22, %v3660_v21  ;;  %v3632_v61 = vld [vmem:[#allocation4 + $0x168] sm:$0xf]  ;;  %v1664_v22 = vperm.slane %v4783_v2, 2 }
 0x377   :  { %2330 = vmatmul.bf16.vlgmr.msra.gmra.mxu2 %v4762_v48  ;;  %2358 = vmatmul.bf16.vlgmr.msrb.gmra.mxu0 %v4762_v48 }
 0x378   :  { %2382 = vmatpush.bf16.msrb.mxu2 %v3765_v31  ;;  %2410 = vmatpush.bf16.msra.mxu0 %v3769_v32  ;;  %v3633_v31 = vor.u32 %v4123_v28, %v3632_v61  ;;  %v3604_v32 = vld [vmem:[#allocation4 + $0x130] sm:$0xf] }
 0x37a   :  { %2367 = vmatpush.bf16.msrb.mxu1 %v3569_v38  ;;  %2395 = vmatpush.bf16.msrb.mxu3 %v3573_v39  ;;  %v3605_v38 = vor.u32 %v4116_v35, %v3604_v32  ;;  %v3576_v39 = vld [vmem:[#allocation4 + $0xf8] sm:$0xf]  ;;  %v1665_v32 = vperm.slane %v4783_v2, 3 }
 0x37c   :  { %2383 = vmatpush.bf16.msrb.mxu2 %v3737_v45  ;;  %2411 = vmatpush.bf16.msra.mxu0 %v3741_v46  ;;  %v3577_v45 = vor.u32 %v4109_v41, %v3576_v39  ;;  %v3548_v46 = vld [vmem:[#allocation4 + $0xc0] sm:$0xf] }
 0x37d   :  { %2316 = vmatmul.bf16.vlgmr.msra.gmra.mxu1 %v4766_v5  ;;  %2344 = vmatmul.bf16.vlgmr.msra.gmra.mxu3 %v4766_v5 }
 0x37e   :  { %2368 = vmatpush.bf16.msrb.mxu1 %v3541_v36  ;;  %2396 = vmatpush.bf16.msrb.mxu3 %v3545_v40  ;;  %v3549_v36 = vor.u32 %v4102_v47, %v3548_v46  ;;  %v3520_v40 = vld [vmem:[#allocation4 + $0x88] sm:$0xf] }
 0x380   :  { %2384 = vmatpush.bf16.msrb.mxu2 %v3709_v57  ;;  %2412 = vmatpush.bf16.msra.mxu0 %v3713_v58  ;;  %v3521_v57 = vor.u32 %v4095_v52, %v3520_v40  ;;  %v3492_v58 = vld [vmem:[#allocation4 + $0x50] sm:$0xf] }
 0x381   :  { %v3493_v62 = vor.u32 %v4088_v59, %v3492_v58 }
 0x382   :  { %2369 = vmatpush.bf16.msrb.mxu1 %v3513_v0  ;;  %2397 = vmatpush.bf16.msrb.mxu3 %v3517_v1  ;;  %v4081_v0 = vld [vmem:[#allocation4 + $0x30] sm:$0xf0] }
 0x383   :  { %v3465_v1 = vor.u32 %v4081_v0, %v3464_v63 }
 0x384   :  { %2385 = vmatpush.bf16.msrb.mxu2 %v3681_v10  ;;  %2413 = vmatpush.bf16.msra.mxu0 %v3685_v11  ;;  %v1663_v11 = vperm.slane %v4783_v2, 1 }
 0x386   :  { %2370 = vmatpush.bf16.msrb.mxu1 %v3485_v13  ;;  %2398 = vmatpush.bf16.msrb.mxu3 %v3489_v14 }
 0x387   :  { %2386 = vmatmul.bf16.vlgmr.msrb.gmra.mxu2 %v4762_v48  ;;  %2414 = vmatmul.bf16.vlgmr.msra.gmra.mxu0 %v4762_v48 }
 0x388   :  { %2434 = vmatpush.bf16.msra.mxu2 %v3885_v12 }
 0x38a   :  { %2371 = vmatpush.bf16.msrb.mxu1 %v3457_v24  ;;  %2399 = vmatpush.bf16.msrb.mxu3 %v3461_v8 }
 0x38c   :  { %2435 = vmatpush.bf16.msra.mxu2 %v3857_v23 }
 0x38d   :  { %2372 = vmatmul.bf16.vlgmr.msrb.gmra.mxu1 %v4766_v5  ;;  %2400 = vmatmul.bf16.vlgmr.msrb.gmra.mxu3 %v4766_v5 }
 0x38e   :  { %2420 = vmatpush.bf16.msra.mxu1 %v3661_v27 }
 0x390   :  { %2436 = vmatpush.bf16.msra.mxu2 %v3829_v20 }
 0x392   :  { %2421 = vmatpush.bf16.msra.mxu1 %v3633_v31 }
 0x394   :  { %2437 = vmatpush.bf16.msra.mxu2 %v3801_v33 }
 0x396   :  { %2422 = vmatpush.bf16.msra.mxu1 %v3605_v38 }
 0x398   :  { %2438 = vmatpush.bf16.msra.mxu2 %v3773_v42 }
 0x39a   :  { %2423 = vmatpush.bf16.msra.mxu1 %v3577_v45 }
 0x39c   :  { %2439 = vmatpush.bf16.msra.mxu2 %v3745_v49 }
 0x39e   :  { %2424 = vmatpush.bf16.msra.mxu1 %v3549_v36  ;;  %v1666_v36 = vperm.slane %v4783_v2, 4 }
 0x3a0   :  { %2440 = vmatpush.bf16.msra.mxu2 %v3717_v54 }
 0x3a2   :  { %2425 = vmatpush.bf16.msra.mxu1 %v3521_v57 }
 0x3a4   :  { %2441 = vmatpush.bf16.msra.mxu2 %v3689_v60 }
 0x3a6   :  { %2426 = vmatpush.bf16.msra.mxu1 %v3493_v62 }
 0x3a7   :  { %2442 = vmatmul.bf16.vlgmr.msra.gmra.mxu2 %v4762_v48 }
 0x3aa   :  { %2427 = vmatpush.bf16.msra.mxu1 %v3465_v1 }
 0x3ad   :  { %2428 = vmatmul.bf16.vlgmr.msra.gmra.mxu1 %v4766_v5 }
 0x3e4   :  { %v2303_v4 = vpop.f32.mrf.mxu0 }
 0x3ea   :  { %v2261_v6 = vpop.f32.mrf.mxu1  ;;  %v2275_v7 = vpop.f32.mrf.mxu2 }
 0x3eb   :  { %v2262_v9 = vadd.f32 %v2261_v6, %v1662_v3 }
 0x3ec   :  { %v2305_v15 = vpop.f32.mrf.mxu0 }
 0x3ed   :  { %v2276_v10 = vadd.f32 %v2275_v7, %v2262_v9 }
 0x3ef   :  { %v3886_v12 = vmul.f32 -1.442695, %v2276_v10 }
 0x3f0   :  { %v2289_v13 = vpop.f32.mrf.mxu3 }
 0x3f1   :  { %4199 = vpow2.f32 %v3886_v12  ;;  %v2290_v48 = vadd.f32 %v2289_v13, %v1663_v11 }
 0x3f2   :  { %v2263_v14 = vpop.f32.mrf.mxu1  ;;  %v2277_v5 = vpop.f32.mrf.mxu2 }
 0x3f3   :  { %v2304_v16 = vadd.f32 %v2303_v4, %v2290_v48  ;;  %v2264_v17 = vadd.f32 %v2263_v14, %v1662_v3 }
 0x3f4   :  { %v2359_v20 = vpop.f32.mrf.mxu0 }
 0x3f5   :  { %v3887_v53 = vmul.f32 -1.442695, %v2304_v16  ;;  %v2278_v18 = vadd.f32 %v2277_v5, %v2264_v17 }
 0x3f7   :  { %v4200_v19 = vpop.eup %4199  ;;  %4201 = vpow2.f32 %v3887_v53  ;;  %v3893_v21 = vmul.f32 -1.442695, %v2278_v18 }
 0x3f8   :  { %v2490_v23 = vadd.f32 1.0, %v4200_v19  ;;  %v2291_v24 = vpop.f32.mrf.mxu3 }
 0x3f9   :  { %4203 = vpow2.f32 %v3893_v21  ;;  %v2292_v8 = vadd.f32 %v2291_v24, %v1663_v11 }
 0x3fa   :  { %4205 = vrcp.f32 %v2490_v23  ;;  %v2317_v25 = vpop.f32.mrf.mxu1  ;;  %v2331_v26 = vpop.f32.mrf.mxu2  ;;  %v2513_v44 = vand.u32 2147483647, %v2490_v23  ;;  %v2515_v45 = vand.u32 2147483648, %v2490_v23  ;;  %vm2509_vm1 = vweird.f32 %v2490_v23 }
 0x3fb   :  { %v2306_v27 = vadd.f32 %v2305_v15, %v2292_v8  ;;  %v2318_v61 = vadd.f32 %v2317_v25, %v1664_v22 }
 0x3fc   :  { %vm2514_vm2 = vcmp.eq.f32.partialorder %v2513_v44, 8.507059e+37  ;;  %v2361_v60 = vpop.f32.mrf.mxu0  ;;  %v2516_v62 = vor.u32 1.1754944e-38, %v2515_v45 }
 0x3fd   :  { %v4202_v28 = vpop.eup %4201  ;;  %v3894_v29 = vmul.f32 -1.442695, %v2306_v27  ;;  %v2332_v30 = vadd.f32 %v2331_v26, %v2318_v61 }
 0x3fe   :  { %v4788_v31 = vadd.f32 1.0, %v4202_v28 }
 0x3ff   :  { %v4204_v35 = vpop.eup %4203  ;;  %4207 = vpow2.f32 %v3894_v29  ;;  %v3888_v33 = vmul.f32 -1.442695, %v2332_v30 }
 0x400   :  { %v4206_v34 = vpop.eup %4205  ;;  %4209 = vrcp.f32 %v4788_v31  ;;  %v2345_v37 = vpop.f32.mrf.mxu3  ;;  %v4792_v39 = vadd.f32 1.0, %v4204_v35  ;;  %v2528_v59 = vand.u32 2147483647, %v4788_v31  ;;  %v2530_v63 = vand.u32 2147483648, %v4788_v31 }
 0x401   :  { %v2505_v38 = vmul.f32 %v4206_v34, %v2490_v23  ;;  %4211 = vpow2.f32 %v3888_v33  ;;  %v2346_v41 = vadd.f32 %v2345_v37, %v1665_v32  ;;  %vm2510_vm0 = vweird.f32 %v4206_v34 }
 0x402   :  { %v2319_v42 = vpop.f32.mrf.mxu1  ;;  %4213 = vrcp.f32 %v4792_v39  ;;  %v2333_v49 = vpop.f32.mrf.mxu2  ;;  %vm2511_vm3 = vmor %vm2509_vm1, %vm2510_vm0  ;;  %vm2524_vm4 = vweird.f32 %v4788_v31  ;;  %v2618_v11 = vand.u32 2147483647, %v4792_v39  ;;  %vm4811_vm6 = vcmp.eq.f32.partialorder %v2528_v59, 8.507059e+37 }
 0x403   :  { %v2506_v43 = vsub.f32 1.0, %v2505_v38  ;;  %v2360_v46 = vadd.f32 %v2359_v20, %v2346_v41  ;;  %v2320_v47 = vadd.f32 %v2319_v42, %v1664_v22  ;;  %v2531_v14 = vor.u32 1.1754944e-38, %v2530_v63 }
 0x404   :  { %vm2614_vm7 = vweird.f32 %v4792_v39  ;;  %v2620_v17 = vand.u32 2147483648, %v4792_v39  ;;  %vm4822_vm10 = vcmp.eq.f32.partialorder %v2618_v11, 8.507059e+37  ;;  %v2415_v35 = vpop.f32.mrf.mxu0 }
 0x405   :  { %v4208_v50 = vpop.eup %4207  ;;  %v2507_v51 = vmul.f32 %v4206_v34, %v2506_v43  ;;  %v3889_v54 = vmul.f32 -1.442695, %v2360_v46  ;;  %v2334_v0 = vadd.f32 %v2333_v49, %v2320_v47 }
 0x406   :  { %v4210_v40 = vpop.eup %4209  ;;  %v4796_v52 = vadd.f32 1.0, %v4208_v50 }
 0x407   :  { %v4212_v56 = vpop.eup %4211  ;;  %v2508_v57 = vadd.f32 %v4206_v34, %v2507_v51  ;;  %v2520_v58 = vmul.f32 %v4210_v40, %v4788_v31  ;;  %vm2525_vm5 = vweird.f32 %v4210_v40  ;;  %v3895_v15 = vmul.f32 -1.442695, %v2334_v0 }
 0x408   :  { %4215 = vrcp.f32 %v4796_v52  ;;  %v2347_v1 = vpop.f32.mrf.mxu3  ;;  %v4214_v3 = vpop.eup %4213  ;;  %v4803_v7 = vadd.f32 1.0, %v4212_v56  ;;  %vm2526_vm8 = vmor %vm2524_vm4, %vm2525_vm5  ;;  %v2635_v26 = vand.u32 2147483648, %v4796_v52  ;;  %v2621_v31 = vor.u32 1.1754944e-38, %v2620_v17 }
 0x409   :  { %v2512_v4 = vsel %vm2511_vm3, %v4206_v34, %v2508_v57  ;;  %v2521_v6 = vsub.f32 1.0, %v2520_v58  ;;  %4217 = vpow2.f32 %v3889_v54  ;;  %v2610_v10 = vmul.f32 %v4214_v3, %v4792_v39 }
 0x40a   :  { %v2517_v9 = vsel %vm2514_vm2, %v2516_v62, %v2512_v4  ;;  %v2373_v12 = vpop.f32.mrf.mxu1  ;;  %4219 = vrcp.f32 %v4803_v7  ;;  %v2348_v53 = vadd.f32 %v2347_v1, %v1665_v32  ;;  %vm2615_vm9 = vweird.f32 %v4214_v3  ;;  %v2387_v23 = vpop.f32.mrf.mxu2 }
 0x40b   :  { %2714 = vst [vmem:[%s4949_s11] sm:$0xff] %v2517_v9  ;;  %v2522_v13 = vmul.f32 %v4210_v40, %v2521_v6  ;;  %v2611_v5 = vsub.f32 1.0, %v2610_v10  ;;  %v2374_v18 = vadd.f32 %v2373_v12, %v1666_v36  ;;  %4221 = vpow2.f32 %v3895_v15  ;;  %vm2616_vm11 = vmor %vm2614_vm7, %vm2615_vm9 }
 0x40c   :  { %v2362_v27 = vadd.f32 %v2361_v60, %v2348_v53  ;;  %vm2629_vm12 = vweird.f32 %v4796_v52  ;;  %v2633_v38 = vand.u32 2147483647, %v4796_v52  ;;  %v2636_v39 = vor.u32 1.1754944e-38, %v2635_v26 }
 0x40d   :  { %v2523_v16 = vadd.f32 %v4210_v40, %v2522_v13  ;;  %v2612_v21 = vmul.f32 %v4214_v3, %v2611_v5  ;;  %v2388_v29 = vadd.f32 %v2387_v23, %v2374_v18  ;;  %v2543_v47 = vand.u32 2147483647, %v4803_v7  ;;  %v2417_v13 = vpop.f32.mrf.mxu0 }
 0x40e   :  { %v4216_v19 = vpop.eup %4215  ;;  %v3896_v33 = vmul.f32 -1.442695, %v2362_v27  ;;  %v2545_v51 = vand.u32 2147483648, %v4803_v7  ;;  %vm2634_vm0 = vcmp.eq.f32.partialorder %v2633_v38, 8.507059e+37  ;;  %vm2539_vm1 = vweird.f32 %v4803_v7 }
 0x40f   :  { %v4218_v24 = vpop.eup %4217  ;;  %v2527_v8 = vsel %vm2526_vm8, %v4210_v40, %v2523_v16  ;;  %v2625_v25 = vmul.f32 %v4216_v19, %v4796_v52  ;;  %v2613_v28 = vadd.f32 %v4214_v3, %v2612_v21  ;;  %vm2630_vm13 = vweird.f32 %v4216_v19 }
 0x410   :  { %v2532_v61 = vsel %vm4811_vm6, %v2531_v14, %v2527_v8  ;;  %v4830_v20 = vadd.f32 1.0, %v4218_v24  ;;  %v4220_v30 = vpop.eup %4219  ;;  %v2401_v34 = vpop.f32.mrf.mxu3  ;;  %v3890_v49 = vmul.f32 -1.442695, %v2388_v29  ;;  %vm2631_vm14 = vmor %vm2629_vm12, %vm2630_vm13  ;;  %v2546_v52 = vor.u32 1.1754944e-38, %v2545_v51 }
 0x411   :  { %2715 = vst [vmem:[%s4949_s11 + $0x8] sm:$0xff] %v2532_v61  ;;  %v2626_v32 = vsub.f32 1.0, %v2625_v25  ;;  %v2617_v37 = vsel %vm2616_vm11, %v4214_v3, %v2613_v28  ;;  %v2535_v41 = vmul.f32 %v4220_v30, %v4803_v7  ;;  %v4222_v45 = vpop.eup %4221  ;;  %v2402_v54 = vadd.f32 %v2401_v34, %v1667_v55 }
 0x412   :  { %4223 = vrcp.f32 %v4830_v20  ;;  %v2622_v42 = vsel %vm4822_vm10, %v2621_v31, %v2617_v37  ;;  %v2375_v44 = vpop.f32.mrf.mxu1  ;;  %v4849_v40 = vadd.f32 1.0, %v4222_v45  ;;  %vm2540_vm15 = vweird.f32 %v4220_v30  ;;  %v2389_v0 = vpop.f32.mrf.mxu2 }
 0x413   :  { %v2627_v43 = vmul.f32 %v4216_v19, %v2626_v32  ;;  %2721 = vst [vmem:[%s4949_s11 + $0x38] sm:$0xff] %v2622_v42  ;;  %v2536_v46 = vsub.f32 1.0, %v2535_v41  ;;  %4225 = vpow2.f32 %v3896_v33  ;;  %v2376_v57 = vadd.f32 %v2375_v44, %v1666_v36  ;;  %vm2541_vm2 = vmor %vm2539_vm1, %vm2540_vm15 }
 0x414   :  { %4227 = vpow2.f32 %v3890_v49  ;;  %v2416_v63 = vadd.f32 %v2415_v35, %v2402_v54  ;;  %vm2544_vm3 = vcmp.eq.f32.partialorder %v2543_v47, 8.507059e+37  ;;  %v2558_v5 = vand.u32 2147483647, %v4830_v20 }
 0x415   :  { %v2628_v50 = vadd.f32 %v4216_v19, %v2627_v43  ;;  %v2537_v56 = vmul.f32 %v4220_v30, %v2536_v46  ;;  %4229 = vrcp.f32 %v4849_v40  ;;  %v2390_v36 = vadd.f32 %v2389_v0, %v2376_v57 }
 0x416   :  { %v3891_v9 = vmul.f32 -1.442695, %v2416_v63  ;;  %v2560_v15 = vand.u32 2147483648, %v4830_v20  ;;  %vm2554_vm5 = vweird.f32 %v4830_v20  ;;  %vm2559_vm7 = vcmp.eq.f32.partialorder %v2558_v5, 8.507059e+37 }
 0x417   :  { %v2632_v58 = vsel %vm2631_vm14, %v4216_v19, %v2628_v50  ;;  %v2538_v62 = vadd.f32 %v4220_v30, %v2537_v56  ;;  %v3897_v48 = vmul.f32 -1.442695, %v2390_v36  ;;  %v2648_v8 = vand.u32 2147483647, %v4849_v40 }
 0x418   :  { %v4224_v59 = vpop.eup %4223  ;;  %v2637_v60 = vsel %vm2634_vm0, %v2636_v39, %v2632_v58  ;;  %v2403_v3 = vpop.f32.mrf.mxu3  ;;  %4231 = vpow2.f32 %v3891_v9  ;;  %v2561_v22 = vor.u32 1.1754944e-38, %v2560_v15  ;;  %v2650_v25 = vand.u32 2147483648, %v4849_v40 }
 0x419   :  { %2722 = vst [vmem:[%s4949_s11 + $0x40] sm:$0xff] %v2637_v60  ;;  %v2550_v1 = vmul.f32 %v4224_v59, %v4830_v20  ;;  %v4226_v4 = vpop.eup %4225  ;;  %v2542_v6 = vsel %vm2541_vm2, %v4220_v30, %v2538_v62  ;;  %v2404_v10 = vadd.f32 %v2403_v3, %v1667_v55  ;;  %vm2555_vm4 = vweird.f32 %v4224_v59 }
 0x41a   :  { %v2547_v7 = vsel %vm2544_vm3, %v2546_v52, %v2542_v6  ;;  %v4865_v12 = vadd.f32 1.0, %v4226_v4  ;;  %v4228_v14 = vpop.eup %4227  ;;  %vm2556_vm6 = vmor %vm2554_vm5, %vm2555_vm4  ;;  %vm2644_vm9 = vweird.f32 %v4849_v40  ;;  %vm2649_vm11 = vcmp.eq.f32.partialorder %v2648_v8, 8.507059e+37 }
 0x41b   :  { %v2551_v11 = vsub.f32 1.0, %v2550_v1  ;;  %2716 = vst [vmem:[%s4949_s11 + $0x10] sm:$0xff] %v2547_v7  ;;  %v2418_v16 = vadd.f32 %v2417_v13, %v2404_v10  ;;  %v4230_v17 = vpop.eup %4229  ;;  %v4874_v18 = vadd.f32 1.0, %v4228_v14  ;;  %v2651_v32 = vor.u32 1.1754944e-38, %v2650_v25 }
 0x41c   :  { %4233 = vrcp.f32 %v4865_v12  ;;  %v2640_v55 = vmul.f32 %v4230_v17, %v4849_v40  ;;  %vm2645_vm8 = vweird.f32 %v4230_v17  ;;  %v1668_v35 = vperm.slane %v4783_v2, 6 }
 0x41d   :  { %v2552_v53 = vmul.f32 %v4224_v59, %v2551_v11  ;;  %4235 = vpow2.f32 %v3897_v48  ;;  %v3898_v21 = vmul.f32 -1.442695, %v2418_v16  ;;  %vm2646_vm10 = vmor %vm2644_vm9, %vm2645_vm8  ;;  %v2665_v38 = vand.u32 2147483648, %v4865_v12 }
 0x41e   :  { %v2641_v23 = vsub.f32 1.0, %v2640_v55  ;;  %4237 = vrcp.f32 %v4874_v18  ;;  %v4232_v26 = vpop.eup %4231  ;;  %v2663_v2 = vand.u32 2147483647, %v4865_v12  ;;  %vm2659_vm13 = vweird.f32 %v4865_v12 }
 0x41f   :  { %v2553_v19 = vadd.f32 %v4224_v59, %v2552_v53  ;;  %4239 = vpow2.f32 %v3898_v21  ;;  %v4883_v20 = vadd.f32 1.0, %v4232_v26  ;;  %v2666_v51 = vor.u32 1.1754944e-38, %v2665_v38 }
 0x420   :  { %v2642_v61 = vmul.f32 %v4230_v17, %v2641_v23  ;;  %v2575_v40 = vand.u32 2147483648, %v4874_v18  ;;  %v2573_v58 = vand.u32 2147483647, %v4874_v18  ;;  %vm2664_vm0 = vcmp.eq.f32.partialorder %v2663_v2, 8.507059e+37 }
 0x421   :  { %v2557_v24 = vsel %vm2556_vm6, %v4224_v59, %v2553_v19  ;;  %4241 = vrcp.f32 %v4883_v20  ;;  %vm2569_vm1 = vweird.f32 %v4874_v18  ;;  %v2590_v0 = vand.u32 2147483648, %v4883_v20 }
 0x422   :  { %v2562_v27 = vsel %vm2559_vm7, %v2561_v22, %v2557_v24  ;;  %v4234_v28 = vpop.eup %4233  ;;  %v2643_v29 = vadd.f32 %v4230_v17, %v2642_v61  ;;  %v2576_v1 = vor.u32 1.1754944e-38, %v2575_v40  ;;  %vm2574_vm3 = vcmp.eq.f32.partialorder %v2573_v58, 8.507059e+37 }
 0x423   :  { %2717 = vst [vmem:[%s4949_s11 + $0x18] sm:$0xff] %v2562_v27  ;;  %v2655_v30 = vmul.f32 %v4234_v28, %v4865_v12  ;;  %v4236_v31 = vpop.eup %4235  ;;  %vm2660_vm12 = vweird.f32 %v4234_v28  ;;  %v2588_v6 = vand.u32 2147483647, %v4883_v20  ;;  %vm2584_vm5 = vweird.f32 %v4883_v20 }
 0x424   :  { %v4238_v33 = vpop.eup %4237  ;;  %v2647_v34 = vsel %vm2646_vm10, %v4230_v17, %v2643_v29  ;;  %v4890_v41 = vadd.f32 1.0, %v4236_v31  ;;  %vm2661_vm14 = vmor %vm2659_vm13, %vm2660_vm12  ;;  %v2591_v48 = vor.u32 1.1754944e-38, %v2590_v0 }
 0x425   :  { %v2656_v37 = vsub.f32 1.0, %v2655_v30  ;;  %v4240_v42 = vpop.eup %4239  ;;  %v2652_v43 = vsel %vm2649_vm11, %v2651_v32, %v2647_v34  ;;  %v2565_v39 = vmul.f32 %v4238_v33, %v4874_v18  ;;  %vm2570_vm15 = vweird.f32 %v4238_v33 }
 0x426   :  { %2723 = vst [vmem:[%s4949_s11 + $0x48] sm:$0xff] %v2652_v43  ;;  %4243 = vrcp.f32 %v4890_v41  ;;  %v4899_v49 = vadd.f32 1.0, %v4240_v42  ;;  %vm2571_vm2 = vmor %vm2569_vm1, %vm2570_vm15  ;;  %v2680_v16 = vand.u32 2147483648, %v4890_v41  ;;  %v2678_v18 = vand.u32 2147483647, %v4890_v41 }
 0x427   :  { %v2657_v45 = vmul.f32 %v4234_v28, %v2656_v37  ;;  %v2566_v47 = vsub.f32 1.0, %v2565_v39  ;;  %v4242_v56 = vpop.eup %4241  ;;  %vm2589_vm8 = vcmp.eq.f32.partialorder %v2588_v6, 8.507059e+37  ;;  %vm2674_vm9 = vweird.f32 %v4890_v41 }
 0x428   :  { %4245 = vrcp.f32 %v4899_v49  ;;  %v2580_v60 = vmul.f32 %v4242_v56, %v4883_v20  ;;  %vm2585_vm4 = vweird.f32 %v4242_v56  ;;  %v2695_v8 = vand.u32 2147483648, %v4899_v49 }
 0x429   :  { %v2658_v50 = vadd.f32 %v4234_v28, %v2657_v45  ;;  %v2567_v57 = vmul.f32 %v4238_v33, %v2566_v47  ;;  %vm2586_vm6 = vmor %vm2584_vm5, %vm2585_vm4  ;;  %v2681_v26 = vor.u32 1.1754944e-38, %v2680_v16  ;;  %v2693_v61 = vand.u32 2147483647, %v4899_v49 }
 0x42a   :  { %v2429_v44 = vpop.f32.mrf.mxu1  ;;  %v2443_v46 = vpop.f32.mrf.mxu2  ;;  %v2581_v36 = vsub.f32 1.0, %v2580_v60  ;;  %vm2679_vm12 = vcmp.eq.f32.partialorder %v2678_v18, 8.507059e+37  ;;  %vm2689_vm13 = vweird.f32 %v4899_v49  ;;  %v2696_v31 = vor.u32 1.1754944e-38, %v2695_v8 }
 0x42b   :  { %v2430_v54 = vadd.f32 %v2429_v44, %v1668_v35  ;;  %v2662_v59 = vsel %vm2661_vm14, %v4234_v28, %v2658_v50  ;;  %v2568_v63 = vadd.f32 %v4238_v33, %v2567_v57  ;;  %vm2694_vm15 = vcmp.eq.f32.partialorder %v2693_v61, 8.507059e+37 }
 0x42c   :  { %v2667_v62 = vsel %vm2664_vm0, %v2666_v51, %v2662_v59  ;;  %v4244_v52 = vpop.eup %4243  ;;  %v2582_v11 = vmul.f32 %v4242_v56, %v2581_v36 }
 0x42d   :  { %2724 = vst [vmem:[%s4949_s11 + $0x50] sm:$0xff] %v2667_v62  ;;  %v2444_v3 = vadd.f32 %v2443_v46, %v2430_v54  ;;  %v2572_v4 = vsel %vm2571_vm2, %v4238_v33, %v2568_v63  ;;  %v2670_v9 = vmul.f32 %v4244_v52, %v4890_v41  ;;  %vm2675_vm7 = vweird.f32 %v4244_v52 }
 0x42e   :  { %v2577_v7 = vsel %vm2574_vm3, %v2576_v1, %v2572_v4  ;;  %v4246_v13 = vpop.eup %4245  ;;  %v2583_v15 = vadd.f32 %v4242_v56, %v2582_v11  ;;  %vm2676_vm10 = vmor %vm2674_vm9, %vm2675_vm7 }
 0x42f   :  { %v3892_v12 = vmul.f32 -1.442695, %v2444_v3  ;;  %2718 = vst [vmem:[%s4949_s11 + $0x20] sm:$0xff] %v2577_v7  ;;  %v2671_v14 = vsub.f32 1.0, %v2670_v9  ;;  %v2685_v17 = vmul.f32 %v4246_v13, %v4899_v49  ;;  %vm2690_vm11 = vweird.f32 %v4246_v13 }
 0x430   :  { %v2587_v21 = vsel %vm2586_vm6, %v4242_v56, %v2583_v15  ;;  %vm2691_vm14 = vmor %vm2689_vm13, %vm2690_vm11 }
 0x431   :  { %4247 = vpow2.f32 %v3892_v12  ;;  %v2672_v55 = vmul.f32 %v4244_v52, %v2671_v14  ;;  %v2686_v22 = vsub.f32 1.0, %v2685_v17  ;;  %v2592_v23 = vsel %vm2589_vm8, %v2591_v48, %v2587_v21 }
 0x432   :  { %v2431_v10 = vpop.f32.mrf.mxu1  ;;  %v2445_v53 = vpop.f32.mrf.mxu2  ;;  %2719 = vst [vmem:[%s4949_s11 + $0x28] sm:$0xff] %v2592_v23 }
 0x433   :  { %v2432_v5 = vadd.f32 %v2431_v10, %v1668_v35  ;;  %v2673_v24 = vadd.f32 %v4244_v52, %v2672_v55  ;;  %v2687_v27 = vmul.f32 %v4246_v13, %v2686_v22 }
 0x435   :  { %v2446_v19 = vadd.f32 %v2445_v53, %v2432_v5  ;;  %v2677_v28 = vsel %vm2676_vm10, %v4244_v52, %v2673_v24  ;;  %v2688_v30 = vadd.f32 %v4246_v13, %v2687_v27 }
 0x436   :  { %v2682_v29 = vsel %vm2679_vm12, %v2681_v26, %v2677_v28 }
 0x437   :  { %v3899_v25 = vmul.f32 -1.442695, %v2446_v19  ;;  %v4248_v20 = vpop.eup %4247  ;;  %2725 = vst [vmem:[%s4949_s11 + $0x58] sm:$0xff] %v2682_v29  ;;  %v2692_v35 = vsel %vm2691_vm14, %v4246_v13, %v2688_v30 }
 0x438   :  { %v2496_v32 = vadd.f32 1.0, %v4248_v20  ;;  %v2697_v33 = vsel %vm2694_vm15, %v2696_v31, %v2692_v35 }
 0x439   :  { %4249 = vpow2.f32 %v3899_v25  ;;  %2726 = vst [vmem:[%s4949_s11 + $0x60] sm:$0xff] %v2697_v33 }
 0x43a   :  { %4251 = vrcp.f32 %v2496_v32  ;;  %v2605_v43 = vand.u32 2147483648, %v2496_v32  ;;  %v2603_v45 = vand.u32 2147483647, %v2496_v32  ;;  %vm2599_vm1 = vweird.f32 %v2496_v32 }
 0x43c   :  { %v2606_v47 = vor.u32 1.1754944e-38, %v2605_v43  ;;  %vm2604_vm3 = vcmp.eq.f32.partialorder %v2603_v45, 8.507059e+37 }
 0x43f   :  { %v4250_v34 = vpop.eup %4249 }
 0x440   :  { %v2503_v37 = vadd.f32 1.0, %v4250_v34  ;;  %v4252_v38 = vpop.eup %4251 }
 0x441   :  { %v2595_v41 = vmul.f32 %v4252_v38, %v2496_v32  ;;  %vm2600_vm0 = vweird.f32 %v4252_v38 }
 0x442   :  { %4253 = vrcp.f32 %v2503_v37  ;;  %vm2601_vm2 = vmor %vm2599_vm1, %vm2600_vm0  ;;  %v2710_v51 = vand.u32 2147483648, %v2503_v37  ;;  %v2708_v56 = vand.u32 2147483647, %v2503_v37  ;;  %vm2704_vm5 = vweird.f32 %v2503_v37 }
 0x443   :  { %v2596_v42 = vsub.f32 1.0, %v2595_v41 }
 0x444   :  { %v2711_v58 = vor.u32 1.1754944e-38, %v2710_v51  ;;  %vm2709_vm7 = vcmp.eq.f32.partialorder %v2708_v56, 8.507059e+37 }
 0x445   :  { %v2597_v44 = vmul.f32 %v4252_v38, %v2596_v42 }
 0x447   :  { %v2598_v46 = vadd.f32 %v4252_v38, %v2597_v44 }
 0x448   :  { %v4254_v39 = vpop.eup %4253 }
 0x449   :  { %v2700_v2 = vmul.f32 %v4254_v39, %v2503_v37  ;;  %v2602_v50 = vsel %vm2601_vm2, %v4252_v38, %v2598_v46  ;;  %vm2705_vm4 = vweird.f32 %v4254_v39 }
 0x44a   :  { %v2607_v40 = vsel %vm2604_vm3, %v2606_v47, %v2602_v50  ;;  %vm2706_vm6 = vmor %vm2704_vm5, %vm2705_vm4 }
 0x44b   :  { %v2701_v49 = vsub.f32 1.0, %v2700_v2  ;;  %2720 = vst [vmem:[%s4949_s11 + $0x30] sm:$0xff] %v2607_v40 }
 0x44d   :  { %v2702_v54 = vmul.f32 %v4254_v39, %v2701_v49 }
 0x44f   :  { %v2703_v57 = vadd.f32 %v4254_v39, %v2702_v54 }
 0x451   :  { %v2707_v59 = vsel %vm2706_vm6, %v4254_v39, %v2703_v57 }
 0x452   :  { %v2712_v60 = vsel %vm2709_vm7, %v2711_v58, %v2707_v59 }
 0x453   :  { %2727 = vst [vmem:[%s4949_s11 + $0x68] sm:$0xff] %v2712_v60 }
 0x454   :  { %2736 = vsyncpa [#allocation3], 1 }
 0x455   :  { %2737 = vsyncpa [#allocation5], 1 }

</bundles_post_ra>
